<compile_context>
chip_gen: v5e
topology: v5e:2x2
jax: 0.10.0
libtpu: 0.0.40
codegen_flags: <defaults>
</compile_context>

<pallas_src>
import functools

import jax
import jax.numpy as jnp
from jax import lax
from jax.experimental import pallas as pl
from jax.experimental.pallas import tpu as pltpu


def _conv_image(x_ref, w_ref, patch_ref, b, *, kh, kw, Cin, Wp, L):
    """Conv for image `b` of the current block as ONE large-K MXU matmul.

    x_ref     : (B, Cin, Hp*Wp)  bf16, channel-major, padded, spatially flattened
    w_ref     : (Cout, K)        bf16, K = kh*kw*Cin, column order (dy, dx, ci)
    patch_ref : (K, L)           bf16 VMEM scratch (im2col; pixels on the lane axis)
    returns   : (Cout, L)        f32 conv output in the shift-window layout
    """
    for dy in range(kh):
        for dx in range(kw):
            off = dy * Wp + dx
            t0 = (dy * kw + dx) * Cin
            # Lane-dense tap build: one contiguous (Cin, L) slice per (dy, dx).
            patch_ref[t0:t0 + Cin, :] = x_ref[b, :, off:off + L]
    # Single matmul with K = kh*kw*Cin; output already (Cout, pixels) -> no transpose.
    return jnp.dot(w_ref[...], patch_ref[...], preferred_element_type=jnp.float32)


def _conv_stats_kernel(x_ref, w_ref, mask_ref, psum_ref, psumsq_ref, patch_ref,
                       *, B, kh, kw, Cin, Wp, L):
    """Pass 1: per-grid-step BN partial statistics only (conv is NOT written to HBM)."""
    Cout = w_ref.shape[0]
    m = mask_ref[...]                                   # (1, L) valid-pixel mask (f32)
    s = jnp.zeros((Cout, 1), jnp.float32)
    ss = jnp.zeros((Cout, 1), jnp.float32)
    for b in range(B):
        acc = _conv_image(x_ref, w_ref, patch_ref, b,
                          kh=kh, kw=kw, Cin=Cin, Wp=Wp, L=L)
        s = s + jnp.sum(acc * m, axis=1, keepdims=True)
        ss = ss + jnp.sum(acc * acc * m, axis=1, keepdims=True)
    psum_ref[0] = s
    psumsq_ref[0] = ss


def _conv_bn_relu_kernel(x_ref, w_ref, scale_ref, shift_ref, out_ref, patch_ref,
                         *, B, kh, kw, Cin, Wp, L, Hout, Wout):
    """Pass 2: recompute conv fused with BN affine + ReLU; write final output once."""
    scale = scale_ref[...]                              # (Cout, 1) f32
    shift = shift_ref[...]                              # (Cout, 1) f32
    for b in range(B):
        acc = _conv_image(x_ref, w_ref, patch_ref, b,
                          kh=kh, kw=kw, Cin=Cin, Wp=Wp, L=L)
        y = jnp.maximum(acc * scale + shift, 0.0)       # f32 VPU math (v5e-friendly)
        # Compact shift-window layout (Cout, L) -> (Cout, Hout*Wout): drop the
        # (Wp - Wout) wrap-around columns of every output row.  Static slices only;
        # the HBM writeback of the (B, Cout, HW) block stays fully lane-dense.
        # TODO(synk): for very large Hout, store the Wp-strided layout and let the
        # consumer fuse the compaction instead of Hout small VMEM stores.
        for oy in range(Hout):
            out_ref[b, :, oy * Wout:(oy + 1) * Wout] = y[:, oy * Wp:oy * Wp + Wout]


def _vmem_capacity_bytes():
    try:
        return int(pltpu.get_tpu_info().vmem_capacity_bytes)
    except Exception:
        return 64 * 1024 * 1024                         # conservative (v7x-sized) fallback


def conv_block_forward(x_nchw, weight_oihw, bias, gamma, beta, *, padding, eps=1e-5):
    """ConvBlock forward (train-mode BN). x: (N, Cin, H, W) f32 -> (N, Cout, H', W') f32."""
    del bias  # conv bias cancels exactly under train-mode BatchNorm mean subtraction

    N, Cin, H, W = x_nchw.shape
    Cout, _, kh, kw = weight_oihw.shape
    Hp, Wp = H + 2 * padding, W + 2 * padding
    Hout, Wout = Hp - kh + 1, Wp - kw + 1
    HW = Hout * Wout
    K = kh * kw * Cin
    # Shift-window conv-as-matmul: flatten padded image as q = y*Wp + x; tap (dy, dx)
    # for output position q is x_flat[:, q + dy*Wp + dx], i.e. one contiguous slice of
    # length L per tap.  Columns with (q % Wp) >= Wout are wrap-around garbage: they
    # are masked out of the BN stats and never stored in pass 2.
    L = (Hout - 1) * Wp + Wout

    # Input glue: pad + flatten (NCHW is already channel-major, so no transpose).
    x_flat = jnp.pad(
        x_nchw, ((0, 0), (0, 0), (padding, padding), (padding, padding))
    ).reshape(N, Cin, Hp * Wp).astype(jnp.bfloat16)
    # (O, I, kh, kw) -> (O, kh, kw, I) -> (Cout, K); column order (dy, dx, ci) matches
    # the im2col row order above.
    w_t = jnp.transpose(weight_oihw, (0, 2, 3, 1)).reshape(Cout, K).astype(jnp.bfloat16)

    q = jnp.arange(L, dtype=jnp.int32)
    mask = ((q % Wp) < Wout).astype(jnp.float32).reshape(1, L)

    # ---- Per-generation VMEM budgeting: images-per-step B and vmem limit. ----
    vmem_cap = _vmem_capacity_bytes()
    budget = (vmem_cap * 3) // 4                 # ~48 MiB on v7x (64 MiB), ~96 MiB on v5e/v6e
    fixed = K * L * 2 + Cout * K * 2 + 2 * Cout * 4 + L * 4       # scratch + weights + affine + mask
    per_img = 2 * (Cin * Hp * Wp * 2 + Cout * HW * 4)             # double-buffered in/out blocks
    b_max = max(1, (budget - fixed) // per_img)
    B = 1
    for cand in range(1, N + 1):
        # Largest divisor of N that fits VMEM; keep >=2 grid steps when N allows so the
        # batch axis still pipelines / megacore-shards.
        if N % cand == 0 and cand <= b_max and (N // cand >= 2 or N < 4):
            B = cand
    G = N // B

    cparams = pltpu.CompilerParams(
        dimension_semantics=("parallel",),       # megacore-shard the batch axis (v7x)
        vmem_limit_bytes=int(budget),
    )

    # ---- Pass 1: conv -> BN partial stats only (no conv intermediate in HBM). ----
    psum, psumsq = pl.pallas_call(
        functools.partial(_conv_stats_kernel, B=B, kh=kh, kw=kw, Cin=Cin, Wp=Wp, L=L),
        out_shape=(
            jax.ShapeDtypeStruct((G, Cout, 1), jnp.float32),
            jax.ShapeDtypeStruct((G, Cout, 1), jnp.float32),
        ),
        grid=(G,),
        in_specs=[
            pl.BlockSpec((B, Cin, Hp * Wp), lambda g: (g, 0, 0)),
            pl.BlockSpec((Cout, K), lambda g: (0, 0)),
            pl.BlockSpec((1, L), lambda g: (0, 0)),
        ],
        out_specs=(
            pl.BlockSpec((1, Cout, 1), lambda g: (g, 0, 0)),
            pl.BlockSpec((1, Cout, 1), lambda g: (g, 0, 0)),
        ),
        scratch_shapes=[pltpu.VMEM((K, L), jnp.bfloat16)],
        compiler_params=cparams,
    )(x_flat, w_t, mask)

    # ---- Tiny O(G*Cout) reduction + BN affine folding (plain JAX, f32). ----
    # TODO(synk): switch to centered per-step sums if post-conv activations ever have a
    # DC offset large enough for E[x^2]-mean^2 cancellation to matter.
    cnt = jnp.float32(N * HW)
    mean = jnp.sum(psum[:, :, 0], axis=0) / cnt          # (Cout,)
    ex2 = jnp.sum(psumsq[:, :, 0], axis=0) / cnt
    var = jnp.maximum(ex2 - mean * mean, 0.0)            # biased batch variance
    inv_std = lax.rsqrt(var + eps)
    scale_vec = gamma.astype(jnp.float32) * inv_std
    shift_vec = beta.astype(jnp.float32) - mean * scale_vec
    scale2 = scale_vec.reshape(Cout, 1)
    shift2 = shift_vec.reshape(Cout, 1)

    # ---- Pass 2: conv recompute fused with BN affine + ReLU; single output write. ----
    out = pl.pallas_call(
        functools.partial(_conv_bn_relu_kernel, B=B, kh=kh, kw=kw, Cin=Cin, Wp=Wp, L=L,
                          Hout=Hout, Wout=Wout),
        out_shape=jax.ShapeDtypeStruct((N, Cout, HW), jnp.float32),
        grid=(G,),
        in_specs=[
            pl.BlockSpec((B, Cin, Hp * Wp), lambda g: (g, 0, 0)),
            pl.BlockSpec((Cout, K), lambda g: (0, 0)),
            pl.BlockSpec((Cout, 1), lambda g: (0, 0)),
            pl.BlockSpec((Cout, 1), lambda g: (0, 0)),
        ],
        out_specs=pl.BlockSpec((B, Cout, HW), lambda g: (g, 0, 0)),
        scratch_shapes=[pltpu.VMEM((K, L), jnp.bfloat16)],
        compiler_params=cparams,
    )(x_flat, w_t, scale2, shift2)

    # Free reshape: (N, Cout, H*W) is already NCHW-ordered.
    return out.reshape(N, Cout, Hout, Wout)


def _reference_forward(x_nchw, weight_oihw, bias, gamma, beta, *, padding, eps=1e-5):
    """Pure-JAX f32 reference matching PyTorch Conv2d + BatchNorm2d(train) + ReLU."""
    y = lax.conv_general_dilated(
        x_nchw, weight_oihw,
        window_strides=(1, 1),
        padding=[(padding, padding), (padding, padding)],
        dimension_numbers=("NCHW", "OIHW", "NCHW"),
    ) + bias.reshape(1, -1, 1, 1)
    mean = jnp.mean(y, axis=(0, 2, 3), keepdims=True)
    var = jnp.mean((y - mean) ** 2, axis=(0, 2, 3), keepdims=True)  # biased
    y = (y - mean) / jnp.sqrt(var + eps)
    y = y * gamma.reshape(1, -1, 1, 1) + beta.reshape(1, -1, 1, 1)
    return jnp.maximum(y, 0.0)


if __name__ == "__main__":
    # Shapes consistent with ConvBlock(in_channels=4, out_channels=8, kernel_size=3, padding=1)
    N, Cin, H, W = 2, 4, 16, 16
    Cout, Ksz, PAD = 8, 3, 1

    key = jax.random.PRNGKey(0)
    kx, kw_key, kb_key = jax.random.split(key, 3)

    x = jax.random.normal(kx, (N, Cin, H, W), dtype=jnp.float32)

    fan_in = Cin * Ksz * Ksz
    bound = 1.0 / jnp.sqrt(fan_in)
    weight = jax.random.uniform(kw_key, (Cout, Cin, Ksz, Ksz), jnp.float32, -bound, bound)
    bias = jax.random.uniform(kb_key, (Cout,), jnp.float32, -bound, bound)
    gamma = jnp.ones((Cout,), jnp.float32)   # BatchNorm2d default init
    beta = jnp.zeros((Cout,), jnp.float32)

    fwd = jax.jit(functools.partial(conv_block_forward, padding=PAD))
    out = fwd(x, weight, bias, gamma, beta)
    out = jax.block_until_ready(out)

    ref = _reference_forward(x, weight, bias, gamma, beta, padding=PAD)
    assert out.shape == (N, Cout, H, W)
    # Tolerance loosened vs. the f32 reference because matmul operands are bf16
    # (f32 accumulation); observed error is ~1e-2 worst case at these shapes.
    assert jnp.allclose(out, ref, atol=2e-2, rtol=2e-2), "mismatch vs reference"

    print("KERNEL_OK")
</pallas_src>

<mosaic_0001>
module attributes {stable_mosaic.version = 11 : i64} {
  func.func @_conv_bn_relu_kernel(%arg0: i32, %arg1: memref<2x4x324xbf16, #tpu.memory_space<vmem>>, %arg2: memref<8x36xbf16, #tpu.memory_space<vmem>>, %arg3: memref<8x1xf32, #tpu.memory_space<vmem>>, %arg4: memref<8x1xf32, #tpu.memory_space<vmem>>, %arg5: memref<2x8x256xf32, #tpu.memory_space<vmem>>, %arg6: memref<36x286xbf16, #tpu.memory_space<vmem>>) attributes {dimension_semantics = [#tpu.dimension_semantics<parallel>], iteration_bounds = array<i64: 1>, scalar_prefetch = 0 : i64, scratch_operands = 1 : i64, tpu.core_type = #tpu.core_type<tc>, window_params = [{transform_indices = @transform_0, window_bounds = array<i64: 2, 4, 324>}, {pipeline_mode = #tpu.pipeline_mode<synchronous>, transform_indices = @transform_1, window_bounds = array<i64: 8, 36>}, {pipeline_mode = #tpu.pipeline_mode<synchronous>, transform_indices = @transform_2, window_bounds = array<i64: 8, 1>}, {pipeline_mode = #tpu.pipeline_mode<synchronous>, transform_indices = @transform_3, window_bounds = array<i64: 8, 1>}, {transform_indices = @transform_4, window_bounds = array<i64: 2, 8, 256>}]} {
    %c0 = arith.constant 0 : index
    %c0_0 = arith.constant 0 : index
    %0 = vector.load %arg3[%c0, %c0_0] : memref<8x1xf32, #tpu.memory_space<vmem>>, vector<8x1xf32>
    %c0_1 = arith.constant 0 : index
    %c0_2 = arith.constant 0 : index
    %1 = vector.load %arg4[%c0_1, %c0_2] : memref<8x1xf32, #tpu.memory_space<vmem>>, vector<8x1xf32>
    %c0_3 = arith.constant 0 : index
    %c0_4 = arith.constant 0 : index
    %c0_5 = arith.constant 0 : index
    %2 = vector.load %arg1[%c0_3, %c0_4, %c0_5] : memref<2x4x324xbf16, #tpu.memory_space<vmem>>, vector<1x4x286xbf16>
    %3 = vector.shape_cast %2 : vector<1x4x286xbf16> to vector<4x286xbf16>
    %c0_6 = arith.constant 0 : index
    %c0_7 = arith.constant 0 : index
    %4 = vector.load %arg6[%c0_6, %c0_7] : memref<36x286xbf16, #tpu.memory_space<vmem>>, vector<4x286xbf16>
    tpu.vector_store %arg6[%c0_6, %c0_7], %3 {strides = array<i32>} : memref<36x286xbf16, #tpu.memory_space<vmem>>, vector<4x286xbf16>,
    %c0_8 = arith.constant 0 : index
    %c0_9 = arith.constant 0 : index
    %c1 = arith.constant 1 : index
    %5 = vector.load %arg1[%c0_8, %c0_9, %c1] : memref<2x4x324xbf16, #tpu.memory_space<vmem>>, vector<1x4x286xbf16>
    %6 = vector.shape_cast %5 : vector<1x4x286xbf16> to vector<4x286xbf16>
    %c4 = arith.constant 4 : index
    %c0_10 = arith.constant 0 : index
    %7 = vector.load %arg6[%c4, %c0_10] : memref<36x286xbf16, #tpu.memory_space<vmem>>, vector<4x286xbf16>
    tpu.vector_store %arg6[%c4, %c0_10], %6 {strides = array<i32>} : memref<36x286xbf16, #tpu.memory_space<vmem>>, vector<4x286xbf16>,
    %c0_11 = arith.constant 0 : index
    %c0_12 = arith.constant 0 : index
    %c2 = arith.constant 2 : index
    %8 = vector.load %arg1[%c0_11, %c0_12, %c2] : memref<2x4x324xbf16, #tpu.memory_space<vmem>>, vector<1x4x286xbf16>
    %9 = vector.shape_cast %8 : vector<1x4x286xbf16> to vector<4x286xbf16>
    %c8 = arith.constant 8 : index
    %c0_13 = arith.constant 0 : index
    %10 = vector.load %arg6[%c8, %c0_13] : memref<36x286xbf16, #tpu.memory_space<vmem>>, vector<4x286xbf16>
    tpu.vector_store %arg6[%c8, %c0_13], %9 {strides = array<i32>} : memref<36x286xbf16, #tpu.memory_space<vmem>>, vector<4x286xbf16>,
    %c0_14 = arith.constant 0 : index
    %c0_15 = arith.constant 0 : index
    %c18 = arith.constant 18 : index
    %11 = vector.load %arg1[%c0_14, %c0_15, %c18] : memref<2x4x324xbf16, #tpu.memory_space<vmem>>, vector<1x4x286xbf16>
    %12 = vector.shape_cast %11 : vector<1x4x286xbf16> to vector<4x286xbf16>
    %c12 = arith.constant 12 : index
    %c0_16 = arith.constant 0 : index
    %13 = vector.load %arg6[%c12, %c0_16] : memref<36x286xbf16, #tpu.memory_space<vmem>>, vector<4x286xbf16>
    tpu.vector_store %arg6[%c12, %c0_16], %12 {strides = array<i32>} : memref<36x286xbf16, #tpu.memory_space<vmem>>, vector<4x286xbf16>,
    %c0_17 = arith.constant 0 : index
    %c0_18 = arith.constant 0 : index
    %c19 = arith.constant 19 : index
    %14 = vector.load %arg1[%c0_17, %c0_18, %c19] : memref<2x4x324xbf16, #tpu.memory_space<vmem>>, vector<1x4x286xbf16>
    %15 = vector.shape_cast %14 : vector<1x4x286xbf16> to vector<4x286xbf16>
    %c16 = arith.constant 16 : index
    %c0_19 = arith.constant 0 : index
    %16 = vector.load %arg6[%c16, %c0_19] : memref<36x286xbf16, #tpu.memory_space<vmem>>, vector<4x286xbf16>
    tpu.vector_store %arg6[%c16, %c0_19], %15 {strides = array<i32>} : memref<36x286xbf16, #tpu.memory_space<vmem>>, vector<4x286xbf16>,
    %c0_20 = arith.constant 0 : index
    %c0_21 = arith.constant 0 : index
    %c20 = arith.constant 20 : index
    %17 = vector.load %arg1[%c0_20, %c0_21, %c20] : memref<2x4x324xbf16, #tpu.memory_space<vmem>>, vector<1x4x286xbf16>
    %18 = vector.shape_cast %17 : vector<1x4x286xbf16> to vector<4x286xbf16>
    %c20_22 = arith.constant 20 : index
    %c0_23 = arith.constant 0 : index
    %19 = vector.load %arg6[%c20_22, %c0_23] : memref<36x286xbf16, #tpu.memory_space<vmem>>, vector<4x286xbf16>
    tpu.vector_store %arg6[%c20_22, %c0_23], %18 {strides = array<i32>} : memref<36x286xbf16, #tpu.memory_space<vmem>>, vector<4x286xbf16>,
    %c0_24 = arith.constant 0 : index
    %c0_25 = arith.constant 0 : index
    %c36 = arith.constant 36 : index
    %20 = vector.load %arg1[%c0_24, %c0_25, %c36] : memref<2x4x324xbf16, #tpu.memory_space<vmem>>, vector<1x4x286xbf16>
    %21 = vector.shape_cast %20 : vector<1x4x286xbf16> to vector<4x286xbf16>
    %c24 = arith.constant 24 : index
    %c0_26 = arith.constant 0 : index
    %22 = vector.load %arg6[%c24, %c0_26] : memref<36x286xbf16, #tpu.memory_space<vmem>>, vector<4x286xbf16>
    tpu.vector_store %arg6[%c24, %c0_26], %21 {strides = array<i32>} : memref<36x286xbf16, #tpu.memory_space<vmem>>, vector<4x286xbf16>,
    %c0_27 = arith.constant 0 : index
    %c0_28 = arith.constant 0 : index
    %c37 = arith.constant 37 : index
    %23 = vector.load %arg1[%c0_27, %c0_28, %c37] : memref<2x4x324xbf16, #tpu.memory_space<vmem>>, vector<1x4x286xbf16>
    %24 = vector.shape_cast %23 : vector<1x4x286xbf16> to vector<4x286xbf16>
    %c28 = arith.constant 28 : index
    %c0_29 = arith.constant 0 : index
    %25 = vector.load %arg6[%c28, %c0_29] : memref<36x286xbf16, #tpu.memory_space<vmem>>, vector<4x286xbf16>
    tpu.vector_store %arg6[%c28, %c0_29], %24 {strides = array<i32>} : memref<36x286xbf16, #tpu.memory_space<vmem>>, vector<4x286xbf16>,
    %c0_30 = arith.constant 0 : index
    %c0_31 = arith.constant 0 : index
    %c38 = arith.constant 38 : index
    %26 = vector.load %arg1[%c0_30, %c0_31, %c38] : memref<2x4x324xbf16, #tpu.memory_space<vmem>>, vector<1x4x286xbf16>
    %27 = vector.shape_cast %26 : vector<1x4x286xbf16> to vector<4x286xbf16>
    %c32 = arith.constant 32 : index
    %c0_32 = arith.constant 0 : index
    %28 = vector.load %arg6[%c32, %c0_32] : memref<36x286xbf16, #tpu.memory_space<vmem>>, vector<4x286xbf16>
    tpu.vector_store %arg6[%c32, %c0_32], %27 {strides = array<i32>} : memref<36x286xbf16, #tpu.memory_space<vmem>>, vector<4x286xbf16>,
    %c0_33 = arith.constant 0 : index
    %c0_34 = arith.constant 0 : index
    %29 = vector.load %arg2[%c0_33, %c0_34] : memref<8x36xbf16, #tpu.memory_space<vmem>>, vector<8x36xbf16>
    %c0_35 = arith.constant 0 : index
    %c0_36 = arith.constant 0 : index
    %30 = vector.load %arg6[%c0_35, %c0_36] : memref<36x286xbf16, #tpu.memory_space<vmem>>, vector<36x286xbf16>
    %cst = arith.constant dense<0.000000e+00> : vector<8x286xf32>
    %31 = tpu.matmul %29, %30, %cst {dimension_numbers = #tpu.dot_dimension_numbers<[1], [0], [0], [1], [0, 0, 1, 1], [], []>} : vector<8x36xbf16>, vector<36x286xbf16>, vector<8x286xf32> -> vector<8x286xf32>
    %32 = vector.broadcast %0 : vector<8x1xf32> to vector<8x286xf32>
    %33 = arith.mulf %31, %32 : vector<8x286xf32>
    %34 = vector.broadcast %1 : vector<8x1xf32> to vector<8x286xf32>
    %35 = arith.addf %33, %34 : vector<8x286xf32>
    %cst_37 = arith.constant 0.000000e+00 : f32
    %36 = vector.broadcast %cst_37 : f32 to vector<8x286xf32>
    %37 = arith.maximumf %35, %36 : vector<8x286xf32>
    %38 = vector.extract_strided_slice %37 {offsets = [0, 0], sizes = [8, 16], strides = [1, 1]} : vector<8x286xf32> to vector<8x16xf32>
    %c0_38 = arith.constant 0 : index
    %c0_39 = arith.constant 0 : index
    %c0_40 = arith.constant 0 : index
    %39 = vector.load %arg5[%c0_38, %c0_39, %c0_40] : memref<2x8x256xf32, #tpu.memory_space<vmem>>, vector<1x8x16xf32>
    %40 = vector.shape_cast %39 : vector<1x8x16xf32> to vector<8x16xf32>
    %41 = vector.shape_cast %38 : vector<8x16xf32> to vector<1x8x16xf32>
    tpu.vector_store %arg5[%c0_38, %c0_39, %c0_40], %41 {strides = array<i32>} : memref<2x8x256xf32, #tpu.memory_space<vmem>>, vector<1x8x16xf32>,
    %42 = vector.extract_strided_slice %37 {offsets = [0, 18], sizes = [8, 16], strides = [1, 1]} : vector<8x286xf32> to vector<8x16xf32>
    %c0_41 = arith.constant 0 : index
    %c0_42 = arith.constant 0 : index
    %c16_43 = arith.constant 16 : index
    %43 = vector.load %arg5[%c0_41, %c0_42, %c16_43] : memref<2x8x256xf32, #tpu.memory_space<vmem>>, vector<1x8x16xf32>
    %44 = vector.shape_cast %43 : vector<1x8x16xf32> to vector<8x16xf32>
    %45 = vector.shape_cast %42 : vector<8x16xf32> to vector<1x8x16xf32>
    tpu.vector_store %arg5[%c0_41, %c0_42, %c16_43], %45 {strides = array<i32>} : memref<2x8x256xf32, #tpu.memory_space<vmem>>, vector<1x8x16xf32>,
    %46 = vector.extract_strided_slice %37 {offsets = [0, 36], sizes = [8, 16], strides = [1, 1]} : vector<8x286xf32> to vector<8x16xf32>
    %c0_44 = arith.constant 0 : index
    %c0_45 = arith.constant 0 : index
    %c32_46 = arith.constant 32 : index
    %47 = vector.load %arg5[%c0_44, %c0_45, %c32_46] : memref<2x8x256xf32, #tpu.memory_space<vmem>>, vector<1x8x16xf32>
    %48 = vector.shape_cast %47 : vector<1x8x16xf32> to vector<8x16xf32>
    %49 = vector.shape_cast %46 : vector<8x16xf32> to vector<1x8x16xf32>
    tpu.vector_store %arg5[%c0_44, %c0_45, %c32_46], %49 {strides = array<i32>} : memref<2x8x256xf32, #tpu.memory_space<vmem>>, vector<1x8x16xf32>,
    %50 = vector.extract_strided_slice %37 {offsets = [0, 54], sizes = [8, 16], strides = [1, 1]} : vector<8x286xf32> to vector<8x16xf32>
    %c0_47 = arith.constant 0 : index
    %c0_48 = arith.constant 0 : index
    %c48 = arith.constant 48 : index
    %51 = vector.load %arg5[%c0_47, %c0_48, %c48] : memref<2x8x256xf32, #tpu.memory_space<vmem>>, vector<1x8x16xf32>
    %52 = vector.shape_cast %51 : vector<1x8x16xf32> to vector<8x16xf32>
    %53 = vector.shape_cast %50 : vector<8x16xf32> to vector<1x8x16xf32>
    tpu.vector_store %arg5[%c0_47, %c0_48, %c48], %53 {strides = array<i32>} : memref<2x8x256xf32, #tpu.memory_space<vmem>>, vector<1x8x16xf32>,
    %54 = vector.extract_strided_slice %37 {offsets = [0, 72], sizes = [8, 16], strides = [1, 1]} : vector<8x286xf32> to vector<8x16xf32>
    %c0_49 = arith.constant 0 : index
    %c0_50 = arith.constant 0 : index
    %c64 = arith.constant 64 : index
    %55 = vector.load %arg5[%c0_49, %c0_50, %c64] : memref<2x8x256xf32, #tpu.memory_space<vmem>>, vector<1x8x16xf32>
    %56 = vector.shape_cast %55 : vector<1x8x16xf32> to vector<8x16xf32>
    %57 = vector.shape_cast %54 : vector<8x16xf32> to vector<1x8x16xf32>
    tpu.vector_store %arg5[%c0_49, %c0_50, %c64], %57 {strides = array<i32>} : memref<2x8x256xf32, #tpu.memory_space<vmem>>, vector<1x8x16xf32>,
    %58 = vector.extract_strided_slice %37 {offsets = [0, 90], sizes = [8, 16], strides = [1, 1]} : vector<8x286xf32> to vector<8x16xf32>
    %c0_51 = arith.constant 0 : index
    %c0_52 = arith.constant 0 : index
    %c80 = arith.constant 80 : index
    %59 = vector.load %arg5[%c0_51, %c0_52, %c80] : memref<2x8x256xf32, #tpu.memory_space<vmem>>, vector<1x8x16xf32>
    %60 = vector.shape_cast %59 : vector<1x8x16xf32> to vector<8x16xf32>
    %61 = vector.shape_cast %58 : vector<8x16xf32> to vector<1x8x16xf32>
    tpu.vector_store %arg5[%c0_51, %c0_52, %c80], %61 {strides = array<i32>} : memref<2x8x256xf32, #tpu.memory_space<vmem>>, vector<1x8x16xf32>,
    %62 = vector.extract_strided_slice %37 {offsets = [0, 108], sizes = [8, 16], strides = [1, 1]} : vector<8x286xf32> to vector<8x16xf32>
    %c0_53 = arith.constant 0 : index
    %c0_54 = arith.constant 0 : index
    %c96 = arith.constant 96 : index
    %63 = vector.load %arg5[%c0_53, %c0_54, %c96] : memref<2x8x256xf32, #tpu.memory_space<vmem>>, vector<1x8x16xf32>
    %64 = vector.shape_cast %63 : vector<1x8x16xf32> to vector<8x16xf32>
    %65 = vector.shape_cast %62 : vector<8x16xf32> to vector<1x8x16xf32>
    tpu.vector_store %arg5[%c0_53, %c0_54, %c96], %65 {strides = array<i32>} : memref<2x8x256xf32, #tpu.memory_space<vmem>>, vector<1x8x16xf32>,
    %66 = vector.extract_strided_slice %37 {offsets = [0, 126], sizes = [8, 16], strides = [1, 1]} : vector<8x286xf32> to vector<8x16xf32>
    %c0_55 = arith.constant 0 : index
    %c0_56 = arith.constant 0 : index
    %c112 = arith.constant 112 : index
    %67 = vector.load %arg5[%c0_55, %c0_56, %c112] : memref<2x8x256xf32, #tpu.memory_space<vmem>>, vector<1x8x16xf32>
    %68 = vector.shape_cast %67 : vector<1x8x16xf32> to vector<8x16xf32>
    %69 = vector.shape_cast %66 : vector<8x16xf32> to vector<1x8x16xf32>
    tpu.vector_store %arg5[%c0_55, %c0_56, %c112], %69 {strides = array<i32>} : memref<2x8x256xf32, #tpu.memory_space<vmem>>, vector<1x8x16xf32>,
    %70 = vector.extract_strided_slice %37 {offsets = [0, 144], sizes = [8, 16], strides = [1, 1]} : vector<8x286xf32> to vector<8x16xf32>
    %c0_57 = arith.constant 0 : index
    %c0_58 = arith.constant 0 : index
    %c128 = arith.constant 128 : index
    %71 = vector.load %arg5[%c0_57, %c0_58, %c128] : memref<2x8x256xf32, #tpu.memory_space<vmem>>, vector<1x8x16xf32>
    %72 = vector.shape_cast %71 : vector<1x8x16xf32> to vector<8x16xf32>
    %73 = vector.shape_cast %70 : vector<8x16xf32> to vector<1x8x16xf32>
    tpu.vector_store %arg5[%c0_57, %c0_58, %c128], %73 {strides = array<i32>} : memref<2x8x256xf32, #tpu.memory_space<vmem>>, vector<1x8x16xf32>,
    %74 = vector.extract_strided_slice %37 {offsets = [0, 162], sizes = [8, 16], strides = [1, 1]} : vector<8x286xf32> to vector<8x16xf32>
    %c0_59 = arith.constant 0 : index
    %c0_60 = arith.constant 0 : index
    %c144 = arith.constant 144 : index
    %75 = vector.load %arg5[%c0_59, %c0_60, %c144] : memref<2x8x256xf32, #tpu.memory_space<vmem>>, vector<1x8x16xf32>
    %76 = vector.shape_cast %75 : vector<1x8x16xf32> to vector<8x16xf32>
    %77 = vector.shape_cast %74 : vector<8x16xf32> to vector<1x8x16xf32>
    tpu.vector_store %arg5[%c0_59, %c0_60, %c144], %77 {strides = array<i32>} : memref<2x8x256xf32, #tpu.memory_space<vmem>>, vector<1x8x16xf32>,
    %78 = vector.extract_strided_slice %37 {offsets = [0, 180], sizes = [8, 16], strides = [1, 1]} : vector<8x286xf32> to vector<8x16xf32>
    %c0_61 = arith.constant 0 : index
    %c0_62 = arith.constant 0 : index
    %c160 = arith.constant 160 : index
    %79 = vector.load %arg5[%c0_61, %c0_62, %c160] : memref<2x8x256xf32, #tpu.memory_space<vmem>>, vector<1x8x16xf32>
    %80 = vector.shape_cast %79 : vector<1x8x16xf32> to vector<8x16xf32>
    %81 = vector.shape_cast %78 : vector<8x16xf32> to vector<1x8x16xf32>
    tpu.vector_store %arg5[%c0_61, %c0_62, %c160], %81 {strides = array<i32>} : memref<2x8x256xf32, #tpu.memory_space<vmem>>, vector<1x8x16xf32>,
    %82 = vector.extract_strided_slice %37 {offsets = [0, 198], sizes = [8, 16], strides = [1, 1]} : vector<8x286xf32> to vector<8x16xf32>
    %c0_63 = arith.constant 0 : index
    %c0_64 = arith.constant 0 : index
    %c176 = arith.constant 176 : index
    %83 = vector.load %arg5[%c0_63, %c0_64, %c176] : memref<2x8x256xf32, #tpu.memory_space<vmem>>, vector<1x8x16xf32>
    %84 = vector.shape_cast %83 : vector<1x8x16xf32> to vector<8x16xf32>
    %85 = vector.shape_cast %82 : vector<8x16xf32> to vector<1x8x16xf32>
    tpu.vector_store %arg5[%c0_63, %c0_64, %c176], %85 {strides = array<i32>} : memref<2x8x256xf32, #tpu.memory_space<vmem>>, vector<1x8x16xf32>,
    %86 = vector.extract_strided_slice %37 {offsets = [0, 216], sizes = [8, 16], strides = [1, 1]} : vector<8x286xf32> to vector<8x16xf32>
    %c0_65 = arith.constant 0 : index
    %c0_66 = arith.constant 0 : index
    %c192 = arith.constant 192 : index
    %87 = vector.load %arg5[%c0_65, %c0_66, %c192] : memref<2x8x256xf32, #tpu.memory_space<vmem>>, vector<1x8x16xf32>
    %88 = vector.shape_cast %87 : vector<1x8x16xf32> to vector<8x16xf32>
    %89 = vector.shape_cast %86 : vector<8x16xf32> to vector<1x8x16xf32>
    tpu.vector_store %arg5[%c0_65, %c0_66, %c192], %89 {strides = array<i32>} : memref<2x8x256xf32, #tpu.memory_space<vmem>>, vector<1x8x16xf32>,
    %90 = vector.extract_strided_slice %37 {offsets = [0, 234], sizes = [8, 16], strides = [1, 1]} : vector<8x286xf32> to vector<8x16xf32>
    %c0_67 = arith.constant 0 : index
    %c0_68 = arith.constant 0 : index
    %c208 = arith.constant 208 : index
    %91 = vector.load %arg5[%c0_67, %c0_68, %c208] : memref<2x8x256xf32, #tpu.memory_space<vmem>>, vector<1x8x16xf32>
    %92 = vector.shape_cast %91 : vector<1x8x16xf32> to vector<8x16xf32>
    %93 = vector.shape_cast %90 : vector<8x16xf32> to vector<1x8x16xf32>
    tpu.vector_store %arg5[%c0_67, %c0_68, %c208], %93 {strides = array<i32>} : memref<2x8x256xf32, #tpu.memory_space<vmem>>, vector<1x8x16xf32>,
    %94 = vector.extract_strided_slice %37 {offsets = [0, 252], sizes = [8, 16], strides = [1, 1]} : vector<8x286xf32> to vector<8x16xf32>
    %c0_69 = arith.constant 0 : index
    %c0_70 = arith.constant 0 : index
    %c224 = arith.constant 224 : index
    %95 = vector.load %arg5[%c0_69, %c0_70, %c224] : memref<2x8x256xf32, #tpu.memory_space<vmem>>, vector<1x8x16xf32>
    %96 = vector.shape_cast %95 : vector<1x8x16xf32> to vector<8x16xf32>
    %97 = vector.shape_cast %94 : vector<8x16xf32> to vector<1x8x16xf32>
    tpu.vector_store %arg5[%c0_69, %c0_70, %c224], %97 {strides = array<i32>} : memref<2x8x256xf32, #tpu.memory_space<vmem>>, vector<1x8x16xf32>,
    %98 = vector.extract_strided_slice %37 {offsets = [0, 270], sizes = [8, 16], strides = [1, 1]} : vector<8x286xf32> to vector<8x16xf32>
    %c0_71 = arith.constant 0 : index
    %c0_72 = arith.constant 0 : index
    %c240 = arith.constant 240 : index
    %99 = vector.load %arg5[%c0_71, %c0_72, %c240] : memref<2x8x256xf32, #tpu.memory_space<vmem>>, vector<1x8x16xf32>
    %100 = vector.shape_cast %99 : vector<1x8x16xf32> to vector<8x16xf32>
    %101 = vector.shape_cast %98 : vector<8x16xf32> to vector<1x8x16xf32>
    tpu.vector_store %arg5[%c0_71, %c0_72, %c240], %101 {strides = array<i32>} : memref<2x8x256xf32, #tpu.memory_space<vmem>>, vector<1x8x16xf32>,
    %c1_73 = arith.constant 1 : index
    %c0_74 = arith.constant 0 : index
    %c0_75 = arith.constant 0 : index
    %102 = vector.load %arg1[%c1_73, %c0_74, %c0_75] : memref<2x4x324xbf16, #tpu.memory_space<vmem>>, vector<1x4x286xbf16>
    %103 = vector.shape_cast %102 : vector<1x4x286xbf16> to vector<4x286xbf16>
    %c0_76 = arith.constant 0 : index
    %c0_77 = arith.constant 0 : index
    %104 = vector.load %arg6[%c0_76, %c0_77] : memref<36x286xbf16, #tpu.memory_space<vmem>>, vector<4x286xbf16>
    tpu.vector_store %arg6[%c0_76, %c0_77], %103 {strides = array<i32>} : memref<36x286xbf16, #tpu.memory_space<vmem>>, vector<4x286xbf16>,
    %c1_78 = arith.constant 1 : index
    %c0_79 = arith.constant 0 : index
    %c1_80 = arith.constant 1 : index
    %105 = vector.load %arg1[%c1_78, %c0_79, %c1_80] : memref<2x4x324xbf16, #tpu.memory_space<vmem>>, vector<1x4x286xbf16>
    %106 = vector.shape_cast %105 : vector<1x4x286xbf16> to vector<4x286xbf16>
    %c4_81 = arith.constant 4 : index
    %c0_82 = arith.constant 0 : index
    %107 = vector.load %arg6[%c4_81, %c0_82] : memref<36x286xbf16, #tpu.memory_space<vmem>>, vector<4x286xbf16>
    tpu.vector_store %arg6[%c4_81, %c0_82], %106 {strides = array<i32>} : memref<36x286xbf16, #tpu.memory_space<vmem>>, vector<4x286xbf16>,
    %c1_83 = arith.constant 1 : index
    %c0_84 = arith.constant 0 : index
    %c2_85 = arith.constant 2 : index
    %108 = vector.load %arg1[%c1_83, %c0_84, %c2_85] : memref<2x4x324xbf16, #tpu.memory_space<vmem>>, vector<1x4x286xbf16>
    %109 = vector.shape_cast %108 : vector<1x4x286xbf16> to vector<4x286xbf16>
    %c8_86 = arith.constant 8 : index
    %c0_87 = arith.constant 0 : index
    %110 = vector.load %arg6[%c8_86, %c0_87] : memref<36x286xbf16, #tpu.memory_space<vmem>>, vector<4x286xbf16>
    tpu.vector_store %arg6[%c8_86, %c0_87], %109 {strides = array<i32>} : memref<36x286xbf16, #tpu.memory_space<vmem>>, vector<4x286xbf16>,
    %c1_88 = arith.constant 1 : index
    %c0_89 = arith.constant 0 : index
    %c18_90 = arith.constant 18 : index
    %111 = vector.load %arg1[%c1_88, %c0_89, %c18_90] : memref<2x4x324xbf16, #tpu.memory_space<vmem>>, vector<1x4x286xbf16>
    %112 = vector.shape_cast %111 : vector<1x4x286xbf16> to vector<4x286xbf16>
    %c12_91 = arith.constant 12 : index
    %c0_92 = arith.constant 0 : index
    %113 = vector.load %arg6[%c12_91, %c0_92] : memref<36x286xbf16, #tpu.memory_space<vmem>>, vector<4x286xbf16>
    tpu.vector_store %arg6[%c12_91, %c0_92], %112 {strides = array<i32>} : memref<36x286xbf16, #tpu.memory_space<vmem>>, vector<4x286xbf16>,
    %c1_93 = arith.constant 1 : index
    %c0_94 = arith.constant 0 : index
    %c19_95 = arith.constant 19 : index
    %114 = vector.load %arg1[%c1_93, %c0_94, %c19_95] : memref<2x4x324xbf16, #tpu.memory_space<vmem>>, vector<1x4x286xbf16>
    %115 = vector.shape_cast %114 : vector<1x4x286xbf16> to vector<4x286xbf16>
    %c16_96 = arith.constant 16 : index
    %c0_97 = arith.constant 0 : index
    %116 = vector.load %arg6[%c16_96, %c0_97] : memref<36x286xbf16, #tpu.memory_space<vmem>>, vector<4x286xbf16>
    tpu.vector_store %arg6[%c16_96, %c0_97], %115 {strides = array<i32>} : memref<36x286xbf16, #tpu.memory_space<vmem>>, vector<4x286xbf16>,
    %c1_98 = arith.constant 1 : index
    %c0_99 = arith.constant 0 : index
    %c20_100 = arith.constant 20 : index
    %117 = vector.load %arg1[%c1_98, %c0_99, %c20_100] : memref<2x4x324xbf16, #tpu.memory_space<vmem>>, vector<1x4x286xbf16>
    %118 = vector.shape_cast %117 : vector<1x4x286xbf16> to vector<4x286xbf16>
    %c20_101 = arith.constant 20 : index
    %c0_102 = arith.constant 0 : index
    %119 = vector.load %arg6[%c20_101, %c0_102] : memref<36x286xbf16, #tpu.memory_space<vmem>>, vector<4x286xbf16>
    tpu.vector_store %arg6[%c20_101, %c0_102], %118 {strides = array<i32>} : memref<36x286xbf16, #tpu.memory_space<vmem>>, vector<4x286xbf16>,
    %c1_103 = arith.constant 1 : index
    %c0_104 = arith.constant 0 : index
    %c36_105 = arith.constant 36 : index
    %120 = vector.load %arg1[%c1_103, %c0_104, %c36_105] : memref<2x4x324xbf16, #tpu.memory_space<vmem>>, vector<1x4x286xbf16>
    %121 = vector.shape_cast %120 : vector<1x4x286xbf16> to vector<4x286xbf16>
    %c24_106 = arith.constant 24 : index
    %c0_107 = arith.constant 0 : index
    %122 = vector.load %arg6[%c24_106, %c0_107] : memref<36x286xbf16, #tpu.memory_space<vmem>>, vector<4x286xbf16>
    tpu.vector_store %arg6[%c24_106, %c0_107], %121 {strides = array<i32>} : memref<36x286xbf16, #tpu.memory_space<vmem>>, vector<4x286xbf16>,
    %c1_108 = arith.constant 1 : index
    %c0_109 = arith.constant 0 : index
    %c37_110 = arith.constant 37 : index
    %123 = vector.load %arg1[%c1_108, %c0_109, %c37_110] : memref<2x4x324xbf16, #tpu.memory_space<vmem>>, vector<1x4x286xbf16>
    %124 = vector.shape_cast %123 : vector<1x4x286xbf16> to vector<4x286xbf16>
    %c28_111 = arith.constant 28 : index
    %c0_112 = arith.constant 0 : index
    %125 = vector.load %arg6[%c28_111, %c0_112] : memref<36x286xbf16, #tpu.memory_space<vmem>>, vector<4x286xbf16>
    tpu.vector_store %arg6[%c28_111, %c0_112], %124 {strides = array<i32>} : memref<36x286xbf16, #tpu.memory_space<vmem>>, vector<4x286xbf16>,
    %c1_113 = arith.constant 1 : index
    %c0_114 = arith.constant 0 : index
    %c38_115 = arith.constant 38 : index
    %126 = vector.load %arg1[%c1_113, %c0_114, %c38_115] : memref<2x4x324xbf16, #tpu.memory_space<vmem>>, vector<1x4x286xbf16>
    %127 = vector.shape_cast %126 : vector<1x4x286xbf16> to vector<4x286xbf16>
    %c32_116 = arith.constant 32 : index
    %c0_117 = arith.constant 0 : index
    %128 = vector.load %arg6[%c32_116, %c0_117] : memref<36x286xbf16, #tpu.memory_space<vmem>>, vector<4x286xbf16>
    tpu.vector_store %arg6[%c32_116, %c0_117], %127 {strides = array<i32>} : memref<36x286xbf16, #tpu.memory_space<vmem>>, vector<4x286xbf16>,
    %c0_118 = arith.constant 0 : index
    %c0_119 = arith.constant 0 : index
    %129 = vector.load %arg2[%c0_118, %c0_119] : memref<8x36xbf16, #tpu.memory_space<vmem>>, vector<8x36xbf16>
    %c0_120 = arith.constant 0 : index
    %c0_121 = arith.constant 0 : index
    %130 = vector.load %arg6[%c0_120, %c0_121] : memref<36x286xbf16, #tpu.memory_space<vmem>>, vector<36x286xbf16>
    %cst_122 = arith.constant dense<0.000000e+00> : vector<8x286xf32>
    %131 = tpu.matmul %129, %130, %cst_122 {dimension_numbers = #tpu.dot_dimension_numbers<[1], [0], [0], [1], [0, 0, 1, 1], [], []>} : vector<8x36xbf16>, vector<36x286xbf16>, vector<8x286xf32> -> vector<8x286xf32>
    %132 = vector.broadcast %0 : vector<8x1xf32> to vector<8x286xf32>
    %133 = arith.mulf %131, %132 : vector<8x286xf32>
    %134 = vector.broadcast %1 : vector<8x1xf32> to vector<8x286xf32>
    %135 = arith.addf %133, %134 : vector<8x286xf32>
    %cst_123 = arith.constant 0.000000e+00 : f32
    %136 = vector.broadcast %cst_123 : f32 to vector<8x286xf32>
    %137 = arith.maximumf %135, %136 : vector<8x286xf32>
    %138 = vector.extract_strided_slice %137 {offsets = [0, 0], sizes = [8, 16], strides = [1, 1]} : vector<8x286xf32> to vector<8x16xf32>
    %c1_124 = arith.constant 1 : index
    %c0_125 = arith.constant 0 : index
    %c0_126 = arith.constant 0 : index
    %139 = vector.load %arg5[%c1_124, %c0_125, %c0_126] : memref<2x8x256xf32, #tpu.memory_space<vmem>>, vector<1x8x16xf32>
    %140 = vector.shape_cast %139 : vector<1x8x16xf32> to vector<8x16xf32>
    %141 = vector.shape_cast %138 : vector<8x16xf32> to vector<1x8x16xf32>
    tpu.vector_store %arg5[%c1_124, %c0_125, %c0_126], %141 {strides = array<i32>} : memref<2x8x256xf32, #tpu.memory_space<vmem>>, vector<1x8x16xf32>,
    %142 = vector.extract_strided_slice %137 {offsets = [0, 18], sizes = [8, 16], strides = [1, 1]} : vector<8x286xf32> to vector<8x16xf32>
    %c1_127 = arith.constant 1 : index
    %c0_128 = arith.constant 0 : index
    %c16_129 = arith.constant 16 : index
    %143 = vector.load %arg5[%c1_127, %c0_128, %c16_129] : memref<2x8x256xf32, #tpu.memory_space<vmem>>, vector<1x8x16xf32>
    %144 = vector.shape_cast %143 : vector<1x8x16xf32> to vector<8x16xf32>
    %145 = vector.shape_cast %142 : vector<8x16xf32> to vector<1x8x16xf32>
    tpu.vector_store %arg5[%c1_127, %c0_128, %c16_129], %145 {strides = array<i32>} : memref<2x8x256xf32, #tpu.memory_space<vmem>>, vector<1x8x16xf32>,
    %146 = vector.extract_strided_slice %137 {offsets = [0, 36], sizes = [8, 16], strides = [1, 1]} : vector<8x286xf32> to vector<8x16xf32>
    %c1_130 = arith.constant 1 : index
    %c0_131 = arith.constant 0 : index
    %c32_132 = arith.constant 32 : index
    %147 = vector.load %arg5[%c1_130, %c0_131, %c32_132] : memref<2x8x256xf32, #tpu.memory_space<vmem>>, vector<1x8x16xf32>
    %148 = vector.shape_cast %147 : vector<1x8x16xf32> to vector<8x16xf32>
    %149 = vector.shape_cast %146 : vector<8x16xf32> to vector<1x8x16xf32>
    tpu.vector_store %arg5[%c1_130, %c0_131, %c32_132], %149 {strides = array<i32>} : memref<2x8x256xf32, #tpu.memory_space<vmem>>, vector<1x8x16xf32>,
    %150 = vector.extract_strided_slice %137 {offsets = [0, 54], sizes = [8, 16], strides = [1, 1]} : vector<8x286xf32> to vector<8x16xf32>
    %c1_133 = arith.constant 1 : index
    %c0_134 = arith.constant 0 : index
    %c48_135 = arith.constant 48 : index
    %151 = vector.load %arg5[%c1_133, %c0_134, %c48_135] : memref<2x8x256xf32, #tpu.memory_space<vmem>>, vector<1x8x16xf32>
    %152 = vector.shape_cast %151 : vector<1x8x16xf32> to vector<8x16xf32>
    %153 = vector.shape_cast %150 : vector<8x16xf32> to vector<1x8x16xf32>
    tpu.vector_store %arg5[%c1_133, %c0_134, %c48_135], %153 {strides = array<i32>} : memref<2x8x256xf32, #tpu.memory_space<vmem>>, vector<1x8x16xf32>,
    %154 = vector.extract_strided_slice %137 {offsets = [0, 72], sizes = [8, 16], strides = [1, 1]} : vector<8x286xf32> to vector<8x16xf32>
    %c1_136 = arith.constant 1 : index
    %c0_137 = arith.constant 0 : index
    %c64_138 = arith.constant 64 : index
    %155 = vector.load %arg5[%c1_136, %c0_137, %c64_138] : memref<2x8x256xf32, #tpu.memory_space<vmem>>, vector<1x8x16xf32>
    %156 = vector.shape_cast %155 : vector<1x8x16xf32> to vector<8x16xf32>
    %157 = vector.shape_cast %154 : vector<8x16xf32> to vector<1x8x16xf32>
    tpu.vector_store %arg5[%c1_136, %c0_137, %c64_138], %157 {strides = array<i32>} : memref<2x8x256xf32, #tpu.memory_space<vmem>>, vector<1x8x16xf32>,
    %158 = vector.extract_strided_slice %137 {offsets = [0, 90], sizes = [8, 16], strides = [1, 1]} : vector<8x286xf32> to vector<8x16xf32>
    %c1_139 = arith.constant 1 : index
    %c0_140 = arith.constant 0 : index
    %c80_141 = arith.constant 80 : index
    %159 = vector.load %arg5[%c1_139, %c0_140, %c80_141] : memref<2x8x256xf32, #tpu.memory_space<vmem>>, vector<1x8x16xf32>
    %160 = vector.shape_cast %159 : vector<1x8x16xf32> to vector<8x16xf32>
    %161 = vector.shape_cast %158 : vector<8x16xf32> to vector<1x8x16xf32>
    tpu.vector_store %arg5[%c1_139, %c0_140, %c80_141], %161 {strides = array<i32>} : memref<2x8x256xf32, #tpu.memory_space<vmem>>, vector<1x8x16xf32>,
    %162 = vector.extract_strided_slice %137 {offsets = [0, 108], sizes = [8, 16], strides = [1, 1]} : vector<8x286xf32> to vector<8x16xf32>
    %c1_142 = arith.constant 1 : index
    %c0_143 = arith.constant 0 : index
    %c96_144 = arith.constant 96 : index
    %163 = vector.load %arg5[%c1_142, %c0_143, %c96_144] : memref<2x8x256xf32, #tpu.memory_space<vmem>>, vector<1x8x16xf32>
    %164 = vector.shape_cast %163 : vector<1x8x16xf32> to vector<8x16xf32>
    %165 = vector.shape_cast %162 : vector<8x16xf32> to vector<1x8x16xf32>
    tpu.vector_store %arg5[%c1_142, %c0_143, %c96_144], %165 {strides = array<i32>} : memref<2x8x256xf32, #tpu.memory_space<vmem>>, vector<1x8x16xf32>,
    %166 = vector.extract_strided_slice %137 {offsets = [0, 126], sizes = [8, 16], strides = [1, 1]} : vector<8x286xf32> to vector<8x16xf32>
    %c1_145 = arith.constant 1 : index
    %c0_146 = arith.constant 0 : index
    %c112_147 = arith.constant 112 : index
    %167 = vector.load %arg5[%c1_145, %c0_146, %c112_147] : memref<2x8x256xf32, #tpu.memory_space<vmem>>, vector<1x8x16xf32>
    %168 = vector.shape_cast %167 : vector<1x8x16xf32> to vector<8x16xf32>
    %169 = vector.shape_cast %166 : vector<8x16xf32> to vector<1x8x16xf32>
    tpu.vector_store %arg5[%c1_145, %c0_146, %c112_147], %169 {strides = array<i32>} : memref<2x8x256xf32, #tpu.memory_space<vmem>>, vector<1x8x16xf32>,
    %170 = vector.extract_strided_slice %137 {offsets = [0, 144], sizes = [8, 16], strides = [1, 1]} : vector<8x286xf32> to vector<8x16xf32>
    %c1_148 = arith.constant 1 : index
    %c0_149 = arith.constant 0 : index
    %c128_150 = arith.constant 128 : index
    %171 = vector.load %arg5[%c1_148, %c0_149, %c128_150] : memref<2x8x256xf32, #tpu.memory_space<vmem>>, vector<1x8x16xf32>
    %172 = vector.shape_cast %171 : vector<1x8x16xf32> to vector<8x16xf32>
    %173 = vector.shape_cast %170 : vector<8x16xf32> to vector<1x8x16xf32>
    tpu.vector_store %arg5[%c1_148, %c0_149, %c128_150], %173 {strides = array<i32>} : memref<2x8x256xf32, #tpu.memory_space<vmem>>, vector<1x8x16xf32>,
    %174 = vector.extract_strided_slice %137 {offsets = [0, 162], sizes = [8, 16], strides = [1, 1]} : vector<8x286xf32> to vector<8x16xf32>
    %c1_151 = arith.constant 1 : index
    %c0_152 = arith.constant 0 : index
    %c144_153 = arith.constant 144 : index
    %175 = vector.load %arg5[%c1_151, %c0_152, %c144_153] : memref<2x8x256xf32, #tpu.memory_space<vmem>>, vector<1x8x16xf32>
    %176 = vector.shape_cast %175 : vector<1x8x16xf32> to vector<8x16xf32>
    %177 = vector.shape_cast %174 : vector<8x16xf32> to vector<1x8x16xf32>
    tpu.vector_store %arg5[%c1_151, %c0_152, %c144_153], %177 {strides = array<i32>} : memref<2x8x256xf32, #tpu.memory_space<vmem>>, vector<1x8x16xf32>,
    %178 = vector.extract_strided_slice %137 {offsets = [0, 180], sizes = [8, 16], strides = [1, 1]} : vector<8x286xf32> to vector<8x16xf32>
    %c1_154 = arith.constant 1 : index
    %c0_155 = arith.constant 0 : index
    %c160_156 = arith.constant 160 : index
    %179 = vector.load %arg5[%c1_154, %c0_155, %c160_156] : memref<2x8x256xf32, #tpu.memory_space<vmem>>, vector<1x8x16xf32>
    %180 = vector.shape_cast %179 : vector<1x8x16xf32> to vector<8x16xf32>
    %181 = vector.shape_cast %178 : vector<8x16xf32> to vector<1x8x16xf32>
    tpu.vector_store %arg5[%c1_154, %c0_155, %c160_156], %181 {strides = array<i32>} : memref<2x8x256xf32, #tpu.memory_space<vmem>>, vector<1x8x16xf32>,
    %182 = vector.extract_strided_slice %137 {offsets = [0, 198], sizes = [8, 16], strides = [1, 1]} : vector<8x286xf32> to vector<8x16xf32>
    %c1_157 = arith.constant 1 : index
    %c0_158 = arith.constant 0 : index
    %c176_159 = arith.constant 176 : index
    %183 = vector.load %arg5[%c1_157, %c0_158, %c176_159] : memref<2x8x256xf32, #tpu.memory_space<vmem>>, vector<1x8x16xf32>
    %184 = vector.shape_cast %183 : vector<1x8x16xf32> to vector<8x16xf32>
    %185 = vector.shape_cast %182 : vector<8x16xf32> to vector<1x8x16xf32>
    tpu.vector_store %arg5[%c1_157, %c0_158, %c176_159], %185 {strides = array<i32>} : memref<2x8x256xf32, #tpu.memory_space<vmem>>, vector<1x8x16xf32>,
    %186 = vector.extract_strided_slice %137 {offsets = [0, 216], sizes = [8, 16], strides = [1, 1]} : vector<8x286xf32> to vector<8x16xf32>
    %c1_160 = arith.constant 1 : index
    %c0_161 = arith.constant 0 : index
    %c192_162 = arith.constant 192 : index
    %187 = vector.load %arg5[%c1_160, %c0_161, %c192_162] : memref<2x8x256xf32, #tpu.memory_space<vmem>>, vector<1x8x16xf32>
    %188 = vector.shape_cast %187 : vector<1x8x16xf32> to vector<8x16xf32>
    %189 = vector.shape_cast %186 : vector<8x16xf32> to vector<1x8x16xf32>
    tpu.vector_store %arg5[%c1_160, %c0_161, %c192_162], %189 {strides = array<i32>} : memref<2x8x256xf32, #tpu.memory_space<vmem>>, vector<1x8x16xf32>,
    %190 = vector.extract_strided_slice %137 {offsets = [0, 234], sizes = [8, 16], strides = [1, 1]} : vector<8x286xf32> to vector<8x16xf32>
    %c1_163 = arith.constant 1 : index
    %c0_164 = arith.constant 0 : index
    %c208_165 = arith.constant 208 : index
    %191 = vector.load %arg5[%c1_163, %c0_164, %c208_165] : memref<2x8x256xf32, #tpu.memory_space<vmem>>, vector<1x8x16xf32>
    %192 = vector.shape_cast %191 : vector<1x8x16xf32> to vector<8x16xf32>
    %193 = vector.shape_cast %190 : vector<8x16xf32> to vector<1x8x16xf32>
    tpu.vector_store %arg5[%c1_163, %c0_164, %c208_165], %193 {strides = array<i32>} : memref<2x8x256xf32, #tpu.memory_space<vmem>>, vector<1x8x16xf32>,
    %194 = vector.extract_strided_slice %137 {offsets = [0, 252], sizes = [8, 16], strides = [1, 1]} : vector<8x286xf32> to vector<8x16xf32>
    %c1_166 = arith.constant 1 : index
    %c0_167 = arith.constant 0 : index
    %c224_168 = arith.constant 224 : index
    %195 = vector.load %arg5[%c1_166, %c0_167, %c224_168] : memref<2x8x256xf32, #tpu.memory_space<vmem>>, vector<1x8x16xf32>
    %196 = vector.shape_cast %195 : vector<1x8x16xf32> to vector<8x16xf32>
    %197 = vector.shape_cast %194 : vector<8x16xf32> to vector<1x8x16xf32>
    tpu.vector_store %arg5[%c1_166, %c0_167, %c224_168], %197 {strides = array<i32>} : memref<2x8x256xf32, #tpu.memory_space<vmem>>, vector<1x8x16xf32>,
    %198 = vector.extract_strided_slice %137 {offsets = [0, 270], sizes = [8, 16], strides = [1, 1]} : vector<8x286xf32> to vector<8x16xf32>
    %c1_169 = arith.constant 1 : index
    %c0_170 = arith.constant 0 : index
    %c240_171 = arith.constant 240 : index
    %199 = vector.load %arg5[%c1_169, %c0_170, %c240_171] : memref<2x8x256xf32, #tpu.memory_space<vmem>>, vector<1x8x16xf32>
    %200 = vector.shape_cast %199 : vector<1x8x16xf32> to vector<8x16xf32>
    %201 = vector.shape_cast %198 : vector<8x16xf32> to vector<1x8x16xf32>
    tpu.vector_store %arg5[%c1_169, %c0_170, %c240_171], %201 {strides = array<i32>} : memref<2x8x256xf32, #tpu.memory_space<vmem>>, vector<1x8x16xf32>,
    return
  }
  func.func @transform_0(%arg0: i32) -> (i32, i32, i32) {
    %c0_i32 = arith.constant 0 : i32
    %c0_i32_0 = arith.constant 0 : i32
    %c0_i32_1 = arith.constant 0 : i32
    return %arg0, %c0_i32, %c0_i32_0 : i32, i32, i32
  }
  func.func @transform_1(%arg0: i32) -> (i32, i32) {
    %c0_i32 = arith.constant 0 : i32
    %c0_i32_0 = arith.constant 0 : i32
    %c0_i32_1 = arith.constant 0 : i32
    return %c0_i32, %c0_i32_0 : i32, i32
  }
  func.func @transform_2(%arg0: i32) -> (i32, i32) {
    %c0_i32 = arith.constant 0 : i32
    %c0_i32_0 = arith.constant 0 : i32
    %c0_i32_1 = arith.constant 0 : i32
    return %c0_i32, %c0_i32_0 : i32, i32
  }
  func.func @transform_3(%arg0: i32) -> (i32, i32) {
    %c0_i32 = arith.constant 0 : i32
    %c0_i32_0 = arith.constant 0 : i32
    %c0_i32_1 = arith.constant 0 : i32
    return %c0_i32, %c0_i32_0 : i32, i32
  }
  func.func @transform_4(%arg0: i32) -> (i32, i32, i32) {
    %c0_i32 = arith.constant 0 : i32
    %c0_i32_0 = arith.constant 0 : i32
    %c0_i32_1 = arith.constant 0 : i32
    return %arg0, %c0_i32, %c0_i32_0 : i32, i32, i32
  }
}

module attributes {stable_mosaic.version = 11 : i64} {
  func.func @_conv_stats_kernel(%arg0: i32, %arg1: memref<2x4x324xbf16, #tpu.memory_space<vmem>>, %arg2: memref<8x36xbf16, #tpu.memory_space<vmem>>, %arg3: memref<1x286xf32, #tpu.memory_space<vmem>>, %arg4: memref<1x8x1xf32, #tpu.memory_space<vmem>>, %arg5: memref<1x8x1xf32, #tpu.memory_space<vmem>>, %arg6: memref<36x286xbf16, #tpu.memory_space<vmem>>) attributes {dimension_semantics = [#tpu.dimension_semantics<parallel>], iteration_bounds = array<i64: 1>, scalar_prefetch = 0 : i64, scratch_operands = 1 : i64, tpu.core_type = #tpu.core_type<tc>, window_params = [{transform_indices = @transform_0, window_bounds = array<i64: 2, 4, 324>}, {pipeline_mode = #tpu.pipeline_mode<synchronous>, transform_indices = @transform_1, window_bounds = array<i64: 8, 36>}, {pipeline_mode = #tpu.pipeline_mode<synchronous>, transform_indices = @transform_2, window_bounds = array<i64: 1, 286>}, {transform_indices = @transform_3, window_bounds = array<i64: 1, 8, 1>}, {transform_indices = @transform_4, window_bounds = array<i64: 1, 8, 1>}]} {
    %c0 = arith.constant 0 : index
    %c0_0 = arith.constant 0 : index
    %0 = vector.load %arg3[%c0, %c0_0] : memref<1x286xf32, #tpu.memory_space<vmem>>, vector<1x286xf32>
    %cst = arith.constant 0.000000e+00 : f32
    %1 = vector.broadcast %cst : f32 to vector<8x1xf32>
    %cst_1 = arith.constant 0.000000e+00 : f32
    %2 = vector.broadcast %cst_1 : f32 to vector<8x1xf32>
    %c0_2 = arith.constant 0 : index
    %c0_3 = arith.constant 0 : index
    %c0_4 = arith.constant 0 : index
    %3 = vector.load %arg1[%c0_2, %c0_3, %c0_4] : memref<2x4x324xbf16, #tpu.memory_space<vmem>>, vector<1x4x286xbf16>
    %4 = vector.shape_cast %3 : vector<1x4x286xbf16> to vector<4x286xbf16>
    %c0_5 = arith.constant 0 : index
    %c0_6 = arith.constant 0 : index
    %5 = vector.load %arg6[%c0_5, %c0_6] : memref<36x286xbf16, #tpu.memory_space<vmem>>, vector<4x286xbf16>
    tpu.vector_store %arg6[%c0_5, %c0_6], %4 {strides = array<i32>} : memref<36x286xbf16, #tpu.memory_space<vmem>>, vector<4x286xbf16>,
    %c0_7 = arith.constant 0 : index
    %c0_8 = arith.constant 0 : index
    %c1 = arith.constant 1 : index
    %6 = vector.load %arg1[%c0_7, %c0_8, %c1] : memref<2x4x324xbf16, #tpu.memory_space<vmem>>, vector<1x4x286xbf16>
    %7 = vector.shape_cast %6 : vector<1x4x286xbf16> to vector<4x286xbf16>
    %c4 = arith.constant 4 : index
    %c0_9 = arith.constant 0 : index
    %8 = vector.load %arg6[%c4, %c0_9] : memref<36x286xbf16, #tpu.memory_space<vmem>>, vector<4x286xbf16>
    tpu.vector_store %arg6[%c4, %c0_9], %7 {strides = array<i32>} : memref<36x286xbf16, #tpu.memory_space<vmem>>, vector<4x286xbf16>,
    %c0_10 = arith.constant 0 : index
    %c0_11 = arith.constant 0 : index
    %c2 = arith.constant 2 : index
    %9 = vector.load %arg1[%c0_10, %c0_11, %c2] : memref<2x4x324xbf16, #tpu.memory_space<vmem>>, vector<1x4x286xbf16>
    %10 = vector.shape_cast %9 : vector<1x4x286xbf16> to vector<4x286xbf16>
    %c8 = arith.constant 8 : index
    %c0_12 = arith.constant 0 : index
    %11 = vector.load %arg6[%c8, %c0_12] : memref<36x286xbf16, #tpu.memory_space<vmem>>, vector<4x286xbf16>
    tpu.vector_store %arg6[%c8, %c0_12], %10 {strides = array<i32>} : memref<36x286xbf16, #tpu.memory_space<vmem>>, vector<4x286xbf16>,
    %c0_13 = arith.constant 0 : index
    %c0_14 = arith.constant 0 : index
    %c18 = arith.constant 18 : index
    %12 = vector.load %arg1[%c0_13, %c0_14, %c18] : memref<2x4x324xbf16, #tpu.memory_space<vmem>>, vector<1x4x286xbf16>
    %13 = vector.shape_cast %12 : vector<1x4x286xbf16> to vector<4x286xbf16>
    %c12 = arith.constant 12 : index
    %c0_15 = arith.constant 0 : index
    %14 = vector.load %arg6[%c12, %c0_15] : memref<36x286xbf16, #tpu.memory_space<vmem>>, vector<4x286xbf16>
    tpu.vector_store %arg6[%c12, %c0_15], %13 {strides = array<i32>} : memref<36x286xbf16, #tpu.memory_space<vmem>>, vector<4x286xbf16>,
    %c0_16 = arith.constant 0 : index
    %c0_17 = arith.constant 0 : index
    %c19 = arith.constant 19 : index
    %15 = vector.load %arg1[%c0_16, %c0_17, %c19] : memref<2x4x324xbf16, #tpu.memory_space<vmem>>, vector<1x4x286xbf16>
    %16 = vector.shape_cast %15 : vector<1x4x286xbf16> to vector<4x286xbf16>
    %c16 = arith.constant 16 : index
    %c0_18 = arith.constant 0 : index
    %17 = vector.load %arg6[%c16, %c0_18] : memref<36x286xbf16, #tpu.memory_space<vmem>>, vector<4x286xbf16>
    tpu.vector_store %arg6[%c16, %c0_18], %16 {strides = array<i32>} : memref<36x286xbf16, #tpu.memory_space<vmem>>, vector<4x286xbf16>,
    %c0_19 = arith.constant 0 : index
    %c0_20 = arith.constant 0 : index
    %c20 = arith.constant 20 : index
    %18 = vector.load %arg1[%c0_19, %c0_20, %c20] : memref<2x4x324xbf16, #tpu.memory_space<vmem>>, vector<1x4x286xbf16>
    %19 = vector.shape_cast %18 : vector<1x4x286xbf16> to vector<4x286xbf16>
    %c20_21 = arith.constant 20 : index
    %c0_22 = arith.constant 0 : index
    %20 = vector.load %arg6[%c20_21, %c0_22] : memref<36x286xbf16, #tpu.memory_space<vmem>>, vector<4x286xbf16>
    tpu.vector_store %arg6[%c20_21, %c0_22], %19 {strides = array<i32>} : memref<36x286xbf16, #tpu.memory_space<vmem>>, vector<4x286xbf16>,
    %c0_23 = arith.constant 0 : index
    %c0_24 = arith.constant 0 : index
    %c36 = arith.constant 36 : index
    %21 = vector.load %arg1[%c0_23, %c0_24, %c36] : memref<2x4x324xbf16, #tpu.memory_space<vmem>>, vector<1x4x286xbf16>
    %22 = vector.shape_cast %21 : vector<1x4x286xbf16> to vector<4x286xbf16>
    %c24 = arith.constant 24 : index
    %c0_25 = arith.constant 0 : index
    %23 = vector.load %arg6[%c24, %c0_25] : memref<36x286xbf16, #tpu.memory_space<vmem>>, vector<4x286xbf16>
    tpu.vector_store %arg6[%c24, %c0_25], %22 {strides = array<i32>} : memref<36x286xbf16, #tpu.memory_space<vmem>>, vector<4x286xbf16>,
    %c0_26 = arith.constant 0 : index
    %c0_27 = arith.constant 0 : index
    %c37 = arith.constant 37 : index
    %24 = vector.load %arg1[%c0_26, %c0_27, %c37] : memref<2x4x324xbf16, #tpu.memory_space<vmem>>, vector<1x4x286xbf16>
    %25 = vector.shape_cast %24 : vector<1x4x286xbf16> to vector<4x286xbf16>
    %c28 = arith.constant 28 : index
    %c0_28 = arith.constant 0 : index
    %26 = vector.load %arg6[%c28, %c0_28] : memref<36x286xbf16, #tpu.memory_space<vmem>>, vector<4x286xbf16>
    tpu.vector_store %arg6[%c28, %c0_28], %25 {strides = array<i32>} : memref<36x286xbf16, #tpu.memory_space<vmem>>, vector<4x286xbf16>,
    %c0_29 = arith.constant 0 : index
    %c0_30 = arith.constant 0 : index
    %c38 = arith.constant 38 : index
    %27 = vector.load %arg1[%c0_29, %c0_30, %c38] : memref<2x4x324xbf16, #tpu.memory_space<vmem>>, vector<1x4x286xbf16>
    %28 = vector.shape_cast %27 : vector<1x4x286xbf16> to vector<4x286xbf16>
    %c32 = arith.constant 32 : index
    %c0_31 = arith.constant 0 : index
    %29 = vector.load %arg6[%c32, %c0_31] : memref<36x286xbf16, #tpu.memory_space<vmem>>, vector<4x286xbf16>
    tpu.vector_store %arg6[%c32, %c0_31], %28 {strides = array<i32>} : memref<36x286xbf16, #tpu.memory_space<vmem>>, vector<4x286xbf16>,
    %c0_32 = arith.constant 0 : index
    %c0_33 = arith.constant 0 : index
    %30 = vector.load %arg2[%c0_32, %c0_33] : memref<8x36xbf16, #tpu.memory_space<vmem>>, vector<8x36xbf16>
    %c0_34 = arith.constant 0 : index
    %c0_35 = arith.constant 0 : index
    %31 = vector.load %arg6[%c0_34, %c0_35] : memref<36x286xbf16, #tpu.memory_space<vmem>>, vector<36x286xbf16>
    %cst_36 = arith.constant dense<0.000000e+00> : vector<8x286xf32>
    %32 = tpu.matmul %30, %31, %cst_36 {dimension_numbers = #tpu.dot_dimension_numbers<[1], [0], [0], [1], [0, 0, 1, 1], [], []>} : vector<8x36xbf16>, vector<36x286xbf16>, vector<8x286xf32> -> vector<8x286xf32>
    %33 = vector.broadcast %0 : vector<1x286xf32> to vector<8x286xf32>
    %34 = arith.mulf %32, %33 : vector<8x286xf32>
    %cst_37 = arith.constant dense<0.000000e+00> : vector<8xf32>
    %35 = vector.multi_reduction <add>, %34, %cst_37 [1] : vector<8x286xf32> to vector<8xf32>
    %36 = vector.shape_cast %35 : vector<8xf32> to vector<8x1xf32>
    %37 = arith.addf %1, %36 : vector<8x1xf32>
    %38 = arith.mulf %32, %32 : vector<8x286xf32>
    %39 = vector.broadcast %0 : vector<1x286xf32> to vector<8x286xf32>
    %40 = arith.mulf %38, %39 : vector<8x286xf32>
    %cst_38 = arith.constant dense<0.000000e+00> : vector<8xf32>
    %41 = vector.multi_reduction <add>, %40, %cst_38 [1] : vector<8x286xf32> to vector<8xf32>
    %42 = vector.shape_cast %41 : vector<8xf32> to vector<8x1xf32>
    %43 = arith.addf %2, %42 : vector<8x1xf32>
    %c1_39 = arith.constant 1 : index
    %c0_40 = arith.constant 0 : index
    %c0_41 = arith.constant 0 : index
    %44 = vector.load %arg1[%c1_39, %c0_40, %c0_41] : memref<2x4x324xbf16, #tpu.memory_space<vmem>>, vector<1x4x286xbf16>
    %45 = vector.shape_cast %44 : vector<1x4x286xbf16> to vector<4x286xbf16>
    %c0_42 = arith.constant 0 : index
    %c0_43 = arith.constant 0 : index
    %46 = vector.load %arg6[%c0_42, %c0_43] : memref<36x286xbf16, #tpu.memory_space<vmem>>, vector<4x286xbf16>
    tpu.vector_store %arg6[%c0_42, %c0_43], %45 {strides = array<i32>} : memref<36x286xbf16, #tpu.memory_space<vmem>>, vector<4x286xbf16>,
    %c1_44 = arith.constant 1 : index
    %c0_45 = arith.constant 0 : index
    %c1_46 = arith.constant 1 : index
    %47 = vector.load %arg1[%c1_44, %c0_45, %c1_46] : memref<2x4x324xbf16, #tpu.memory_space<vmem>>, vector<1x4x286xbf16>
    %48 = vector.shape_cast %47 : vector<1x4x286xbf16> to vector<4x286xbf16>
    %c4_47 = arith.constant 4 : index
    %c0_48 = arith.constant 0 : index
    %49 = vector.load %arg6[%c4_47, %c0_48] : memref<36x286xbf16, #tpu.memory_space<vmem>>, vector<4x286xbf16>
    tpu.vector_store %arg6[%c4_47, %c0_48], %48 {strides = array<i32>} : memref<36x286xbf16, #tpu.memory_space<vmem>>, vector<4x286xbf16>,
    %c1_49 = arith.constant 1 : index
    %c0_50 = arith.constant 0 : index
    %c2_51 = arith.constant 2 : index
    %50 = vector.load %arg1[%c1_49, %c0_50, %c2_51] : memref<2x4x324xbf16, #tpu.memory_space<vmem>>, vector<1x4x286xbf16>
    %51 = vector.shape_cast %50 : vector<1x4x286xbf16> to vector<4x286xbf16>
    %c8_52 = arith.constant 8 : index
    %c0_53 = arith.constant 0 : index
    %52 = vector.load %arg6[%c8_52, %c0_53] : memref<36x286xbf16, #tpu.memory_space<vmem>>, vector<4x286xbf16>
    tpu.vector_store %arg6[%c8_52, %c0_53], %51 {strides = array<i32>} : memref<36x286xbf16, #tpu.memory_space<vmem>>, vector<4x286xbf16>,
    %c1_54 = arith.constant 1 : index
    %c0_55 = arith.constant 0 : index
    %c18_56 = arith.constant 18 : index
    %53 = vector.load %arg1[%c1_54, %c0_55, %c18_56] : memref<2x4x324xbf16, #tpu.memory_space<vmem>>, vector<1x4x286xbf16>
    %54 = vector.shape_cast %53 : vector<1x4x286xbf16> to vector<4x286xbf16>
    %c12_57 = arith.constant 12 : index
    %c0_58 = arith.constant 0 : index
    %55 = vector.load %arg6[%c12_57, %c0_58] : memref<36x286xbf16, #tpu.memory_space<vmem>>, vector<4x286xbf16>
    tpu.vector_store %arg6[%c12_57, %c0_58], %54 {strides = array<i32>} : memref<36x286xbf16, #tpu.memory_space<vmem>>, vector<4x286xbf16>,
    %c1_59 = arith.constant 1 : index
    %c0_60 = arith.constant 0 : index
    %c19_61 = arith.constant 19 : index
    %56 = vector.load %arg1[%c1_59, %c0_60, %c19_61] : memref<2x4x324xbf16, #tpu.memory_space<vmem>>, vector<1x4x286xbf16>
    %57 = vector.shape_cast %56 : vector<1x4x286xbf16> to vector<4x286xbf16>
    %c16_62 = arith.constant 16 : index
    %c0_63 = arith.constant 0 : index
    %58 = vector.load %arg6[%c16_62, %c0_63] : memref<36x286xbf16, #tpu.memory_space<vmem>>, vector<4x286xbf16>
    tpu.vector_store %arg6[%c16_62, %c0_63], %57 {strides = array<i32>} : memref<36x286xbf16, #tpu.memory_space<vmem>>, vector<4x286xbf16>,
    %c1_64 = arith.constant 1 : index
    %c0_65 = arith.constant 0 : index
    %c20_66 = arith.constant 20 : index
    %59 = vector.load %arg1[%c1_64, %c0_65, %c20_66] : memref<2x4x324xbf16, #tpu.memory_space<vmem>>, vector<1x4x286xbf16>
    %60 = vector.shape_cast %59 : vector<1x4x286xbf16> to vector<4x286xbf16>
    %c20_67 = arith.constant 20 : index
    %c0_68 = arith.constant 0 : index
    %61 = vector.load %arg6[%c20_67, %c0_68] : memref<36x286xbf16, #tpu.memory_space<vmem>>, vector<4x286xbf16>
    tpu.vector_store %arg6[%c20_67, %c0_68], %60 {strides = array<i32>} : memref<36x286xbf16, #tpu.memory_space<vmem>>, vector<4x286xbf16>,
    %c1_69 = arith.constant 1 : index
    %c0_70 = arith.constant 0 : index
    %c36_71 = arith.constant 36 : index
    %62 = vector.load %arg1[%c1_69, %c0_70, %c36_71] : memref<2x4x324xbf16, #tpu.memory_space<vmem>>, vector<1x4x286xbf16>
    %63 = vector.shape_cast %62 : vector<1x4x286xbf16> to vector<4x286xbf16>
    %c24_72 = arith.constant 24 : index
    %c0_73 = arith.constant 0 : index
    %64 = vector.load %arg6[%c24_72, %c0_73] : memref<36x286xbf16, #tpu.memory_space<vmem>>, vector<4x286xbf16>
    tpu.vector_store %arg6[%c24_72, %c0_73], %63 {strides = array<i32>} : memref<36x286xbf16, #tpu.memory_space<vmem>>, vector<4x286xbf16>,
    %c1_74 = arith.constant 1 : index
    %c0_75 = arith.constant 0 : index
    %c37_76 = arith.constant 37 : index
    %65 = vector.load %arg1[%c1_74, %c0_75, %c37_76] : memref<2x4x324xbf16, #tpu.memory_space<vmem>>, vector<1x4x286xbf16>
    %66 = vector.shape_cast %65 : vector<1x4x286xbf16> to vector<4x286xbf16>
    %c28_77 = arith.constant 28 : index
    %c0_78 = arith.constant 0 : index
    %67 = vector.load %arg6[%c28_77, %c0_78] : memref<36x286xbf16, #tpu.memory_space<vmem>>, vector<4x286xbf16>
    tpu.vector_store %arg6[%c28_77, %c0_78], %66 {strides = array<i32>} : memref<36x286xbf16, #tpu.memory_space<vmem>>, vector<4x286xbf16>,
    %c1_79 = arith.constant 1 : index
    %c0_80 = arith.constant 0 : index
    %c38_81 = arith.constant 38 : index
    %68 = vector.load %arg1[%c1_79, %c0_80, %c38_81] : memref<2x4x324xbf16, #tpu.memory_space<vmem>>, vector<1x4x286xbf16>
    %69 = vector.shape_cast %68 : vector<1x4x286xbf16> to vector<4x286xbf16>
    %c32_82 = arith.constant 32 : index
    %c0_83 = arith.constant 0 : index
    %70 = vector.load %arg6[%c32_82, %c0_83] : memref<36x286xbf16, #tpu.memory_space<vmem>>, vector<4x286xbf16>
    tpu.vector_store %arg6[%c32_82, %c0_83], %69 {strides = array<i32>} : memref<36x286xbf16, #tpu.memory_space<vmem>>, vector<4x286xbf16>,
    %c0_84 = arith.constant 0 : index
    %c0_85 = arith.constant 0 : index
    %71 = vector.load %arg2[%c0_84, %c0_85] : memref<8x36xbf16, #tpu.memory_space<vmem>>, vector<8x36xbf16>
    %c0_86 = arith.constant 0 : index
    %c0_87 = arith.constant 0 : index
    %72 = vector.load %arg6[%c0_86, %c0_87] : memref<36x286xbf16, #tpu.memory_space<vmem>>, vector<36x286xbf16>
    %cst_88 = arith.constant dense<0.000000e+00> : vector<8x286xf32>
    %73 = tpu.matmul %71, %72, %cst_88 {dimension_numbers = #tpu.dot_dimension_numbers<[1], [0], [0], [1], [0, 0, 1, 1], [], []>} : vector<8x36xbf16>, vector<36x286xbf16>, vector<8x286xf32> -> vector<8x286xf32>
    %74 = vector.broadcast %0 : vector<1x286xf32> to vector<8x286xf32>
    %75 = arith.mulf %73, %74 : vector<8x286xf32>
    %cst_89 = arith.constant dense<0.000000e+00> : vector<8xf32>
    %76 = vector.multi_reduction <add>, %75, %cst_89 [1] : vector<8x286xf32> to vector<8xf32>
    %77 = vector.shape_cast %76 : vector<8xf32> to vector<8x1xf32>
    %78 = arith.addf %37, %77 : vector<8x1xf32>
    %79 = arith.mulf %73, %73 : vector<8x286xf32>
    %80 = vector.broadcast %0 : vector<1x286xf32> to vector<8x286xf32>
    %81 = arith.mulf %79, %80 : vector<8x286xf32>
    %cst_90 = arith.constant dense<0.000000e+00> : vector<8xf32>
    %82 = vector.multi_reduction <add>, %81, %cst_90 [1] : vector<8x286xf32> to vector<8xf32>
    %83 = vector.shape_cast %82 : vector<8xf32> to vector<8x1xf32>
    %84 = arith.addf %43, %83 : vector<8x1xf32>
    %c0_91 = arith.constant 0 : index
    %c0_92 = arith.constant 0 : index
    %c0_93 = arith.constant 0 : index
    %85 = vector.load %arg4[%c0_91, %c0_92, %c0_93] : memref<1x8x1xf32, #tpu.memory_space<vmem>>, vector<1x8x1xf32>
    %86 = vector.shape_cast %85 : vector<1x8x1xf32> to vector<8x1xf32>
    %87 = vector.shape_cast %78 : vector<8x1xf32> to vector<1x8x1xf32>
    tpu.vector_store %arg4[%c0_91, %c0_92, %c0_93], %87 {strides = array<i32>} : memref<1x8x1xf32, #tpu.memory_space<vmem>>, vector<1x8x1xf32>,
    %c0_94 = arith.constant 0 : index
    %c0_95 = arith.constant 0 : index
    %c0_96 = arith.constant 0 : index
    %88 = vector.load %arg5[%c0_94, %c0_95, %c0_96] : memref<1x8x1xf32, #tpu.memory_space<vmem>>, vector<1x8x1xf32>
    %89 = vector.shape_cast %88 : vector<1x8x1xf32> to vector<8x1xf32>
    %90 = vector.shape_cast %84 : vector<8x1xf32> to vector<1x8x1xf32>
    tpu.vector_store %arg5[%c0_94, %c0_95, %c0_96], %90 {strides = array<i32>} : memref<1x8x1xf32, #tpu.memory_space<vmem>>, vector<1x8x1xf32>,
    return
  }
  func.func @transform_0(%arg0: i32) -> (i32, i32, i32) {
    %c0_i32 = arith.constant 0 : i32
    %c0_i32_0 = arith.constant 0 : i32
    %c0_i32_1 = arith.constant 0 : i32
    return %arg0, %c0_i32, %c0_i32_0 : i32, i32, i32
  }
  func.func @transform_1(%arg0: i32) -> (i32, i32) {
    %c0_i32 = arith.constant 0 : i32
    %c0_i32_0 = arith.constant 0 : i32
    %c0_i32_1 = arith.constant 0 : i32
    return %c0_i32, %c0_i32_0 : i32, i32
  }
  func.func @transform_2(%arg0: i32) -> (i32, i32) {
    %c0_i32 = arith.constant 0 : i32
    %c0_i32_0 = arith.constant 0 : i32
    %c0_i32_1 = arith.constant 0 : i32
    return %c0_i32, %c0_i32_0 : i32, i32
  }
  func.func @transform_3(%arg0: i32) -> (i32, i32, i32) {
    %c0_i32 = arith.constant 0 : i32
    %c0_i32_0 = arith.constant 0 : i32
    %c0_i32_1 = arith.constant 0 : i32
    return %arg0, %c0_i32, %c0_i32_0 : i32, i32, i32
  }
  func.func @transform_4(%arg0: i32) -> (i32, i32, i32) {
    %c0_i32 = arith.constant 0 : i32
    %c0_i32_0 = arith.constant 0 : i32
    %c0_i32_1 = arith.constant 0 : i32
    return %arg0, %c0_i32, %c0_i32_0 : i32, i32, i32
  }
}

</mosaic_0001>

<bundles_post_ra>
// kernel: conv_block_forward.3
= control target key start
LH: loop header
LB: loop body
LE: loop exit
PB: predicated region body
PF: predicated region fallthrough
CT: control target
= control target key end

     0   :  { %s865_s21 = smov 127   ;;  %s866_s24 = smov 126   ;;  %vm51_vm0 = vcmask 240642   ;;  %vm28_vm1 = vcmask 238592   ;;  %vm44_vm2 = vcmask 1043456   ;;  %vm46_vm3 = vcmask 1039360   ;;  %s1270_s0 = inlined_call_operand.vmem [shape: bf16[2,4,324], index: 0, kind: input, shape index: {}]   ;;  %s1271_s3 = inlined_call_operand.vmem [shape: f32[8,1], index: 3, kind: input, shape index: {}]   ;;  %s1272_s1 = inlined_call_operand.vmem [shape: bf16[8,36], index: 1, kind: input, shape index: {}]   ;;  %s1273_s2 = inlined_call_operand.vmem [shape: f32[8,1], index: 2, kind: input, shape index: {}]   ;;  %s1274_s4 = inlined_call_operand.vmem [shape: f32[2,8,256], index: 4, kind: output, shape index: {}]  }
   0x1   :  { %v20_v0 = vld [vmem:[%s1270_s0] sm:$0x3f]  ;;  %s867_s27 = smov 110   ;;  %s868_s30 = smov 109   ;;  %v778_v25 = vld [vmem:[%s1270_s0 + $0x6] sm:$0x3f] }
   0x2   :  { %22 = vst [vmem:[#allocation1] ss:$2 sm:$0xff] %v20_v0  ;;  %v30_v1 = vld [vmem:[%s1270_s0] sm:$0x3f]  ;;  %s869_s7 = smov 108   ;;  %s870_s10 = smov 92  }
   0x3   :  { %v53_v4 = vld [vmem:[%s1270_s0] sm:$0x3f]  ;;  %s871_s13 = smov 91   ;;  %s872_s16 = smov 90   ;;  %v779_v28 = vld [vmem:[%s1270_s0 + $0x6] sm:$0x3f] }
   0x4   :  { %v73_v7 = vld [vmem:[%s1270_s0] sm:$0x3f]  ;;  %v780_v31 = vld [vmem:[%s1270_s0 + $0x6] sm:$0x3f]  ;;  %vm67_vm4 = vcmask 1031168   ;;  %vm88_vm5 = vcmask 900096  }
   0x5   :  { %v94_v10 = vld [vmem:[%s1270_s0] sm:$0x3f]  ;;  %v781_v34 = vld [vmem:[%s1270_s0 + $0x6] sm:$0x3f]  ;;  %vm129_vm6 = vcmask 883712   ;;  %vm108_vm7 = vcmask 891904  }
   0x6   :  { %v114_v13 = vld [vmem:[%s1270_s0] sm:$0x3f]  ;;  %v782_v37 = vld [vmem:[%s1270_s0 + $0x6] sm:$0x3f]  ;;  %vm149_vm8 = vcmask 752640   ;;  %vm170_vm9 = vcmask 744448  }
   0x7   :  { %v135_v16 = vld [vmem:[%s1270_s0] sm:$0x3f]  ;;  %v783_v40 = vld [vmem:[%s1270_s0 + $0x6] sm:$0x3f]  ;;  %vm190_vm10 = vcmask 736256   ;;  %vm251_vm11 = vcmask 1041408  }
   0x8   :  { %v155_v19 = vld [vmem:[%s1270_s0] sm:$0x3f]  ;;  %v784_v43 = vld [vmem:[%s1270_s0 + $0x6] sm:$0x3f]  ;;  %vm247_vm12 = vcmask 293888   ;;  %vm319_vm13 = vcmask 130048  }
   0x9   :  { %v23_v2 = vld.sshfl [vmem:[#allocation1] sm:$0xff pattern:$0x75643120]  ;;  %v917_v3 = vld.sshfl [vmem:[#allocation1 + $0x8] sm:$0xff pattern:$0x75643120] }
   0xa   :  { %33 = vst [vmem:[#allocation1 + $0x1] ss:$2 sm:$0xff] %v30_v1  ;;  %v176_v22 = vld [vmem:[%s1270_s0] sm:$0x3f]  ;;  %v785_v47 = vld [vmem:[%s1270_s0 + $0x6] sm:$0x3f] }
   0xb   :  { %27 = vst [vmem:[#allocation2] sm:$0x33] %v23_v2  ;;  %v786_v54 = vld [vmem:[%s1270_s0 + $0x6] sm:$0x3f]  ;;  %s875_s15 = smov 124   ;;  %s876_s18 = smov 120  }
   0xc   :  { %29 = vst.msk [vmem:[#allocation2 + $0x8] sm:$0x3] %vm28_vm1, %v917_v3  ;;  %s877_s19 = smov 114   ;;  %s878_s20 = smov 122   ;;  %vm325_vm14 = vcmask 261248   ;;  %vm330_vm15 = vcmask 392448  }
   0xd   :  { %s879_s22 = smov 116   ;;  %s880_s23 = smov 102  }
   0xe   :  { %s881_s25 = smov 112   ;;  %s882_s26 = smov 104  }
   0xf   :  { %s883_s28 = smov 98   ;;  %s884_s29 = smov 106  }
  0x10   :  { %s885_s5 = smov 100  }
  0x11   :  { %v34_v5 = vld.sshfl [vmem:[#allocation1] sm:$0xff pattern:$0x75643120]  ;;  %v36_v6 = vld.sshfl [vmem:[#allocation1 + $0x8] sm:$0xff pattern:$0x75643120] }
  0x12   :  { %38 = vrot.lane.b32.xlu1 %v34_v5, %s865_s21  ;;  %55 = vst [vmem:[#allocation1] ss:$2 sm:$0xff] %v53_v4  ;;  %40 = vrot.lane.b32.xlu2 %v36_v6, %s865_s21 }
  0x19   :  { %v56_v8 = vld.sshfl [vmem:[#allocation1] sm:$0xff pattern:$0x75643120]  ;;  %v58_v9 = vld.sshfl [vmem:[#allocation1 + $0x8] sm:$0xff pattern:$0x75643120] }
  0x1a   :  { %60 = vrot.lane.b32.xlu0 %v56_v8, %s866_s24  ;;  %62 = vrot.lane.b32.xlu1 %v58_v9, %s866_s24  ;;  %76 = vst [vmem:[#allocation1 + $0x1] ss:$2 sm:$0xff] %v73_v7 }
  0x21   :  { %v79_v11 = vld.sshfl [vmem:[#allocation1 + $0x8] sm:$0xff pattern:$0x75643120]  ;;  %v77_v12 = vld.sshfl [vmem:[#allocation1] sm:$0xff pattern:$0x75643120] }
  0x22   :  { %83 = vrot.lane.b32.xlu0 %v79_v11, %s867_s27  ;;  %96 = vst [vmem:[#allocation1] ss:$2 sm:$0xff] %v94_v10  ;;  %81 = vrot.lane.b32.xlu2 %v77_v12, %s867_s27 }
  0x29   :  { %v97_v14 = vld.sshfl [vmem:[#allocation1] sm:$0xff pattern:$0x75643120]  ;;  %v99_v15 = vld.sshfl [vmem:[#allocation1 + $0x8] sm:$0xff pattern:$0x75643120] }
  0x2a   :  { %101 = vrot.lane.b32.xlu1 %v97_v14, %s868_s30  ;;  %117 = vst [vmem:[#allocation1 + $0x1] ss:$2 sm:$0xff] %v114_v13 }
  0x31   :  { %v118_v17 = vld.sshfl [vmem:[#allocation1] sm:$0xff pattern:$0x75643120]  ;;  %v120_v18 = vld.sshfl [vmem:[#allocation1 + $0x8] sm:$0xff pattern:$0x75643120] }
  0x32   :  { %137 = vst [vmem:[#allocation1] ss:$2 sm:$0xff] %v135_v16  ;;  %103 = vrot.lane.b32.xlu1 %v99_v15, %s868_s30  ;;  %122 = vrot.lane.b32.xlu2 %v118_v17, %s869_s7 }
  0x39   :  { %v138_v20 = vld.sshfl [vmem:[#allocation1] sm:$0xff pattern:$0x75643120]  ;;  %v140_v21 = vld.sshfl [vmem:[#allocation1 + $0x8] sm:$0xff pattern:$0x75643120] }
  0x3a   :  { %142 = vrot.lane.b32.xlu0 %v138_v20, %s870_s10  ;;  %158 = vst [vmem:[#allocation1 + $0x1] ss:$2 sm:$0xff] %v155_v19  ;;  %144 = vrot.lane.b32.xlu1 %v140_v21, %s870_s10 }
  0x3b   :  { %124 = vrot.lane.b32.xlu2 %v120_v18, %s869_s7 }
  0x41   :  { %v161_v23 = vld.sshfl [vmem:[#allocation1 + $0x8] sm:$0xff pattern:$0x75643120]  ;;  %v159_v24 = vld.sshfl [vmem:[#allocation1] sm:$0xff pattern:$0x75643120] }
  0x42   :  { %165 = vrot.lane.b32.xlu0 %v161_v23, %s871_s13  ;;  %178 = vst [vmem:[#allocation1] ss:$2 sm:$0xff] %v176_v22 }
  0x43   :  { %163 = vrot.lane.b32.xlu2 %v159_v24, %s871_s13 }
  0x49   :  { %v179_v26 = vld.sshfl [vmem:[#allocation1] sm:$0xff pattern:$0x75643120]  ;;  %v181_v27 = vld.sshfl [vmem:[#allocation1 + $0x8] sm:$0xff pattern:$0x75643120] }
  0x4a   :  { %183 = vrot.lane.b32.xlu0 %v179_v26, %s872_s16  ;;  %402 = vst [vmem:[#allocation1] ss:$2 sm:$0xff] %v778_v25 }
  0x51   :  { %v961_v29 = vld.sshfl [vmem:[#allocation1] sm:$0xff pattern:$0x75643120]  ;;  %v963_v30 = vld.sshfl [vmem:[#allocation1 + $0x8] sm:$0xff pattern:$0x75643120] }
  0x52   :  { %185 = vrot.lane.b32.xlu0 %v181_v27, %s872_s16  ;;  %412 = vst [vmem:[#allocation1 + $0x1] ss:$2 sm:$0xff] %v779_v28 }
  0x59   :  { %v969_v32 = vld.sshfl [vmem:[#allocation1] sm:$0xff pattern:$0x75643120]  ;;  %v415_v33 = vld.sshfl [vmem:[#allocation1 + $0x8] sm:$0xff pattern:$0x75643120] }
  0x5a   :  { %431 = vst [vmem:[#allocation1] ss:$2 sm:$0xff] %v780_v31 }
  0x61   :  { %v974_v35 = vld.sshfl [vmem:[#allocation1] sm:$0xff pattern:$0x75643120]  ;;  %v976_v36 = vld.sshfl [vmem:[#allocation1 + $0x8] sm:$0xff pattern:$0x75643120] }
  0x62   :  { %451 = vst [vmem:[#allocation1 + $0x1] ss:$2 sm:$0xff] %v781_v34 }
  0x69   :  { %v981_v38 = vld.sshfl [vmem:[#allocation1] sm:$0xff pattern:$0x75643120]  ;;  %v983_v39 = vld.sshfl [vmem:[#allocation1 + $0x8] sm:$0xff pattern:$0x75643120] }
  0x6a   :  { %470 = vst [vmem:[#allocation1] ss:$2 sm:$0xff] %v782_v37 }
  0x6c   :  { %v41_v46 = vpop.permute.xlu2 %40 }
  0x6d   :  { %52 = vst.msk [vmem:[#allocation2 + $0x8] sm:$0xc] %vm51_vm0, %v41_v46  ;;  %v43_v50 = vrot.slane %v41_v46, 4 }
  0x71   :  { %v471_v41 = vld.sshfl [vmem:[#allocation1] sm:$0xff pattern:$0x75643120]  ;;  %v473_v42 = vld.sshfl [vmem:[#allocation1 + $0x8] sm:$0xff pattern:$0x75643120] }
  0x72   :  { %475 = vrot.lane.b32.xlu0 %v471_v41, %s868_s30  ;;  %477 = vrot.lane.b32.xlu1 %v473_v42, %s868_s30  ;;  %490 = vst [vmem:[#allocation1 + $0x1] ss:$2 sm:$0xff] %v783_v40 }
  0x74   :  { %v1033_v17 = vld [vmem:[#allocation2 + $0x8] sm:$0xf] }
  0x75   :  { %408 = vst.msk [vmem:[#allocation2 + $0x8] sm:$0x3] %vm28_vm1, %v963_v30 }
  0x79   :  { %v493_v44 = vld.sshfl [vmem:[#allocation1 + $0x8] sm:$0xff pattern:$0x75643120]  ;;  %v491_v45 = vld.sshfl [vmem:[#allocation1] sm:$0xff pattern:$0x75643120] }
  0x7a   :  { %497 = vrot.lane.b32.xlu0 %v493_v44, %s869_s7  ;;  %509 = vst [vmem:[#allocation1] ss:$2 sm:$0xff] %v784_v43  ;;  %495 = vrot.lane.b32.xlu2 %v491_v45, %s869_s7  ;;  %v873_v43 = vmov 0   ;;  %v19_v44 = vld [vmem:[%s1271_s3] sm:$0xff] }
  0x7b   :  { %864 = vset.pattern.permute.xlu0 %v873_v43  ;;  %863 = vset.pattern.permute.xlu2 %v873_v43 }
  0x7c   :  { %v82_v51 = vpop.permute.xlu2 %81 }
  0x7d   :  { %v85_v4 = vrot.slane %v82_v51, 4 }
  0x81   :  { %v510_v48 = vld.sshfl [vmem:[#allocation1] sm:$0xff pattern:$0x75643120]  ;;  %v512_v49 = vld.sshfl [vmem:[#allocation1 + $0x8] sm:$0xff pattern:$0x75643120] }
  0x82   :  { %514 = vrot.lane.b32.xlu1 %v510_v48, %s870_s10  ;;  %529 = vst [vmem:[#allocation1 + $0x1] ss:$2 sm:$0xff] %v785_v47  ;;  %516 = vrot.lane.b32.xlu2 %v512_v49, %s870_s10 }
  0x84   :  { %v39_v52 = vpop.permute.xlu1 %38 }
  0x85   :  { %v42_v53 = vrot.slane %v39_v52, 4 }
  0x87   :  { %v45_v55 = vsel %vm44_vm2, %v42_v53, %v43_v50 }
  0x88   :  { %v47_v56 = vsel %vm46_vm3, %v39_v52, %v45_v55 }
  0x89   :  { %v532_v57 = vld.sshfl [vmem:[#allocation1 + $0x8] sm:$0xff pattern:$0x75643120]  ;;  %v530_v58 = vld.sshfl [vmem:[#allocation1] sm:$0xff pattern:$0x75643120] }
  0x8a   :  { %536 = vrot.lane.b32.xlu1 %v532_v57, %s871_s13  ;;  %534 = vrot.lane.b32.xlu0 %v530_v58, %s871_s13  ;;  %548 = vst [vmem:[#allocation1] ss:$2 sm:$0xff] %v786_v54 }
  0x8b   :  { %50 = vst [vmem:[#allocation2] sm:$0xcc] %v47_v56 }
  0x8c   :  { %v61_v59 = vpop.permute.xlu0 %60  ;;  %v63_v60 = vpop.permute.xlu1 %62 }
  0x8d   :  { %v64_v61 = vrot.slane %v61_v59, 4  ;;  %v65_v62 = vrot.slane %v63_v60, 4  ;;  %72 = vst.msk [vmem:[#allocation2 + $0x14] sm:$0x3] %vm28_vm1, %v63_v60  ;;  %v123_v63 = vpop.permute.xlu2 %122 }
  0x8e   :  { %v126_v6 = vrot.slane %v123_v63, 4 }
  0x8f   :  { %v66_v0 = vsel %vm44_vm2, %v64_v61, %v65_v62 }
  0x90   :  { %v68_v1 = vsel %vm67_vm4, %v61_v59, %v66_v0 }
  0x91   :  { %v549_v2 = vld.sshfl [vmem:[#allocation1] sm:$0xff pattern:$0x75643120]  ;;  %v551_v3 = vld.sshfl [vmem:[#allocation1 + $0x8] sm:$0xff pattern:$0x75643120] }
  0x92   :  { %553 = vrot.lane.b32.xlu1 %v549_v2, %s872_s16  ;;  %419 = vrot.lane.b32.xlu0 %v415_v33, %s865_s21  ;;  %71 = vst [vmem:[#allocation2 + $0xc] sm:$0x33] %v68_v1  ;;  %v1019_v11 = vld [vmem:[#allocation2] sm:$0xf]  ;;  %v1021_v12 = vld [vmem:[#allocation2 + $0x4] sm:$0xf] }
  0x93   :  { %555 = vrot.lane.b32.xlu2 %v551_v3, %s872_s16  ;;  %407 = vst [vmem:[#allocation2] sm:$0x33] %v961_v29 }
  0x94   :  { %v84_v5 = vpop.permute.xlu0 %83 }
  0x95   :  { %v86_v7 = vrot.slane %v84_v5, 4  ;;  %93 = vst.msk [vmem:[#allocation2 + $0x14] sm:$0xc] %vm51_vm0, %v84_v5  ;;  %v125_v8 = vpop.permute.xlu2 %124 }
  0x96   :  { %v127_v9 = vrot.slane %v125_v8, 4  ;;  %134 = vst.msk [vmem:[#allocation2 + $0x20] sm:$0xc] %vm51_vm0, %v125_v8  ;;  %v18_v8 = vld [vmem:[%s1273_s2] sm:$0xff] }
  0x97   :  { %v87_v10 = vsel %vm44_vm2, %v85_v4, %v86_v7  ;;  %v196_v7 = vld [vmem:[%s1272_s1] sm:$0xf] }
  0x98   :  { %v89_v13 = vsel %vm88_vm5, %v82_v51, %v87_v10  ;;  %v128_v14 = vsel %vm44_vm2, %v126_v6, %v127_v9 }
  0x99   :  { %92 = vst [vmem:[#allocation2 + $0xc] sm:$0xcc] %v89_v13  ;;  %v130_v15 = vsel %vm129_vm6, %v123_v63, %v128_v14 }
  0x9a   :  { %436 = vrot.lane.b32.xlu1 %v974_v35, %s866_s24  ;;  %456 = vrot.lane.b32.xlu0 %v981_v38, %s867_s27  ;;  %133 = vst [vmem:[#allocation2 + $0x18] sm:$0xcc] %v130_v15 }
  0x9b   :  { %417 = vrot.lane.b32.xlu2 %v969_v32, %s865_s21 }
  0x9c   :  { %v102_v16 = vpop.permute.xlu1 %101  ;;  %v832_v62 = vld [vmem:[#allocation2 + $0x10] sm:$0xf0] }
  0x9d   :  { %v105_v18 = vrot.slane %v102_v16, 4  ;;  %v164_v29 = vpop.permute.xlu2 %163  ;;  %v762_v1 = vor.u32 %v832_v62, %v1033_v17 }
  0x9e   :  { %v167_v30 = vrot.slane %v164_v29, 4 }
  0xa0   :  { %v831_v2 = vld [vmem:[#allocation2 + $0x8] sm:$0xf0]  ;;  %v755_v3 = vld [vmem:[#allocation2 + $0xc] sm:$0xf0] }
  0xa1   :  { %v754_v4 = vor.u32 %v831_v2, %v1019_v11  ;;  %v758_v5 = vor.u32 %v1021_v12, %v755_v3 }
  0xa2   :  { %458 = vrot.lane.b32.xlu1 %v983_v39, %s867_s27  ;;  %310 = vperm.xlu0 %864, %v19_v44  }
  0xa3   :  { %438 = vrot.lane.b32.xlu2 %v976_v36, %s866_s24 }
  0xa4   :  { %v104_v19 = vpop.permute.xlu1 %103 }
  0xa5   :  { %v106_v20 = vrot.slane %v104_v19, 4  ;;  %113 = vst.msk [vmem:[#allocation2 + $0x20] sm:$0x3] %vm28_vm1, %v104_v19 }
  0xa7   :  { %v107_v21 = vsel %vm44_vm2, %v105_v18, %v106_v20 }
  0xa8   :  { %v109_v22 = vsel %vm108_vm7, %v102_v16, %v107_v21 }
  0xa9   :  { %112 = vst [vmem:[#allocation2 + $0x18] sm:$0x33] %v109_v22 }
  0xab   :  { %302 = vperm.xlu2 %863, %v18_v8  }
  0xac   :  { %v143_v23 = vpop.permute.xlu0 %142  ;;  %v145_v24 = vpop.permute.xlu1 %144  ;;  %v773_v50 = vld [vmem:[#allocation2 + $0x20] sm:$0xf] }
  0xad   :  { %v146_v25 = vrot.slane %v143_v23, 4  ;;  %v147_v26 = vrot.slane %v145_v24, 4  ;;  %154 = vst.msk [vmem:[#allocation2 + $0x2c] sm:$0x3] %vm28_vm1, %v145_v24 }
  0xaf   :  { %v148_v27 = vsel %vm44_vm2, %v146_v25, %v147_v26 }
  0xb0   :  { %v150_v28 = vsel %vm149_vm8, %v143_v23, %v148_v27  ;;  %v765_v54 = vld [vmem:[#allocation2 + $0x18] sm:$0xf]  ;;  %v833_v55 = vld [vmem:[#allocation2 + $0x1c] sm:$0xf] }
  0xb1   :  { %153 = vst [vmem:[#allocation2 + $0x24] sm:$0x33] %v150_v28 }
  0xb4   :  { %v166_v31 = vpop.permute.xlu0 %165 }
  0xb5   :  { %v168_v32 = vrot.slane %v166_v31, 4  ;;  %175 = vst.msk [vmem:[#allocation2 + $0x2c] sm:$0xc] %vm51_vm0, %v166_v31 }
  0xb7   :  { %v169_v33 = vsel %vm44_vm2, %v167_v30, %v168_v32 }
  0xb8   :  { %v171_v34 = vsel %vm170_vm9, %v164_v29, %v169_v33 }
  0xb9   :  { %174 = vst [vmem:[#allocation2 + $0x24] sm:$0xcc] %v171_v34 }
  0xbc   :  { %v184_v35 = vpop.permute.xlu0 %183  ;;  %v835_v51 = vld [vmem:[#allocation2 + $0x28] sm:$0xf0] }
  0xbd   :  { %v187_v36 = vrot.slane %v184_v35, 4  ;;  %v774_v59 = vor.u32 %v835_v51, %v773_v50 }
  0xc0   :  { %v834_v60 = vld [vmem:[#allocation2 + $0x20] sm:$0xf0]  ;;  %v767_v61 = vld [vmem:[#allocation2 + $0x24] sm:$0xf0] }
  0xc1   :  { %v766_v63 = vor.u32 %v834_v60, %v765_v54  ;;  %v770_v0 = vor.u32 %v833_v55, %v767_v61 }
  0xc4   :  { %v186_v37 = vpop.permute.xlu0 %185 }
  0xc5   :  { %v188_v38 = vrot.slane %v186_v37, 4  ;;  %195 = vst.msk [vmem:[#allocation2 + $0x38] sm:$0x3] %vm28_vm1, %v186_v37 }
  0xc7   :  { %v189_v39 = vsel %vm44_vm2, %v187_v36, %v188_v38 }
  0xc8   :  { %v191_v40 = vsel %vm190_vm10, %v184_v35, %v189_v39 }
  0xc9   :  { %194 = vst [vmem:[#allocation2 + $0x30] sm:$0x33] %v191_v40 }
  0xcc   :  { %v206_v41 = vld [vmem:[#allocation2 + $0x38] sm:$0x3] }
  0xcd   :  { %v231_v42 = vunpack.c.l.b16 %v206_v41 }
  0xcf   :  { %v240_v45 = vpack.c.b16 %v231_v42, %v231_v42 }
  0xd0   :  { %v205_v46 = vld [vmem:[#allocation2 + $0x30] sm:$0x33] }
  0xd1   :  { %v259_v47 = vsel %vm251_vm11, %v240_v45, 0  ;;  %v229_v48 = vunpack.c.l.b16 %v205_v46  ;;  %v230_v49 = vunpack.c.h.b16 %v205_v46 }
  0xd2   :  { %292 = vmatpush.bf16.msra.mxu2 %v259_v47 }
  0xd3   :  { %v238_v52 = vpack.c.b16 %v229_v48, %v229_v48  ;;  %v239_v53 = vpack.c.b16 %v230_v49, %v230_v49 }
  0xd4   :  { %v496_v56 = vpop.permute.xlu2 %495 }
  0xd5   :  { %v253_v57 = vsel %vm251_vm11, %v238_v52, 0  ;;  %v256_v58 = vsel %vm251_vm11, %v239_v53, 0  ;;  %v499_v15 = vrot.slane %v496_v56, 4 }
  0xd6   :  { %266 = vmatpush.bf16.msra.mxu0 %v253_v57  ;;  %279 = vmatpush.bf16.msra.mxu1 %v256_v58 }
  0xd7   :  { %293 = vmatpush.bf16.msra.mxu2 %v774_v59 }
  0xda   :  { %267 = vmatpush.bf16.msra.mxu0 %v766_v63  ;;  %280 = vmatpush.bf16.msra.mxu1 %v770_v0 }
  0xdb   :  { %294 = vmatpush.bf16.msra.mxu2 %v762_v1 }
  0xdc   :  { %v517_v6 = vpop.permute.xlu2 %516 }
  0xdd   :  { %525 = vst.msk [vmem:[#allocation2 + $0x2c] sm:$0x3] %vm28_vm1, %v517_v6  ;;  %v519_v21 = vrot.slane %v517_v6, 4 }
  0xde   :  { %268 = vmatpush.bf16.msra.mxu0 %v754_v4  ;;  %281 = vmatpush.bf16.msra.mxu1 %v758_v5 }
  0xdf   :  { %777 = vmatmul.msk.bf16.vlgmr.msra.gmra.mxu2 %vm247_vm12, %v196_v7 }
  0xe1   :  { %775 = vmatmul.msk.bf16.vlgmr.msra.gmra.mxu0 %vm247_vm12, %v196_v7  ;;  %776 = vmatmul.msk.bf16.vlgmr.msra.gmra.mxu1 %vm247_vm12, %v196_v7 }
  0xe4   :  { %v476_v9 = vpop.permute.xlu0 %475  ;;  %v478_v10 = vpop.permute.xlu1 %477 }
  0xe5   :  { %v479_v11 = vrot.slane %v476_v9, 4  ;;  %v480_v12 = vrot.slane %v478_v10, 4  ;;  %486 = vst.msk [vmem:[#allocation2 + $0x20] sm:$0x3] %vm28_vm1, %v478_v10 }
  0xe7   :  { %v481_v13 = vsel %vm44_vm2, %v479_v11, %v480_v12 }
  0xe8   :  { %v482_v14 = vsel %vm108_vm7, %v476_v9, %v481_v13 }
  0xe9   :  { %485 = vst [vmem:[#allocation2 + $0x18] sm:$0x33] %v482_v14  ;;  %v565_v14 = vld [vmem:[%s1272_s1] sm:$0xf]  ;;  %s874_s1 = smov 118  }
  0xec   :  { %v498_v16 = vpop.permute.xlu0 %497 }
  0xed   :  { %v500_v17 = vrot.slane %v498_v16, 4  ;;  %506 = vst.msk [vmem:[#allocation2 + $0x20] sm:$0xc] %vm51_vm0, %v498_v16  ;;  %v556_v18 = vpop.permute.xlu2 %555 }
  0xee   :  { %564 = vst.msk [vmem:[#allocation2 + $0x38] sm:$0x3] %vm28_vm1, %v556_v18  ;;  %v558_v38 = vrot.slane %v556_v18, 4 }
  0xef   :  { %v501_v19 = vsel %vm44_vm2, %v499_v15, %v500_v17 }
  0xf0   :  { %v502_v20 = vsel %vm129_vm6, %v496_v56, %v501_v19  ;;  %vm391_vm6 = vcmask 818176  }
  0xf1   :  { %505 = vst [vmem:[#allocation2 + $0x18] sm:$0xcc] %v502_v20 }
  0xf4   :  { %v515_v22 = vpop.permute.xlu1 %514  ;;  %v809_v41 = vld [vmem:[#allocation2 + $0x20] sm:$0xf] }
  0xf5   :  { %v518_v23 = vrot.slane %v515_v22, 4  ;;  %v575_v24 = vld [vmem:[#allocation2 + $0x38] sm:$0x3]  ;;  %v418_v25 = vpop.permute.xlu2 %417 }
  0xf6   :  { %v600_v26 = vunpack.c.l.b16 %v575_v24  ;;  %v421_v39 = vrot.slane %v418_v25, 4 }
  0xf7   :  { %v520_v27 = vsel %vm44_vm2, %v518_v23, %v519_v21 }
  0xf8   :  { %v521_v28 = vsel %vm149_vm8, %v515_v22, %v520_v27  ;;  %v609_v29 = vpack.c.b16 %v600_v26, %v600_v26  ;;  %v801_v6 = vld [vmem:[#allocation2 + $0x18] sm:$0xf]  ;;  %v839_v7 = vld [vmem:[#allocation2 + $0x1c] sm:$0xf] }
  0xf9   :  { %524 = vst [vmem:[#allocation2 + $0x24] sm:$0x33] %v521_v28 }
  0xfa   :  { %v626_v30 = vsel %vm251_vm11, %v609_v29, 0 }
  0xfb   :  { %659 = vmatpush.bf16.msrb.mxu1 %v626_v30 }
  0xfc   :  { %v537_v31 = vpop.permute.xlu1 %536  ;;  %v535_v32 = vpop.permute.xlu0 %534 }
  0xfd   :  { %v539_v33 = vrot.slane %v537_v31, 4  ;;  %545 = vst.msk [vmem:[#allocation2 + $0x2c] sm:$0xc] %vm51_vm0, %v537_v31  ;;  %v538_v34 = vrot.slane %v535_v32, 4  ;;  %v439_v35 = vpop.permute.xlu2 %438 }
  0xfe   :  { %447 = vst.msk [vmem:[#allocation2 + $0x14] sm:$0x3] %vm28_vm1, %v439_v35  ;;  %v441_v51 = vrot.slane %v439_v35, 4  ;;  %vm340_vm1 = vcmask 654848  }
  0xff   :  { %v540_v36 = vsel %vm44_vm2, %v538_v34, %v539_v33 }
 0x100   :  { %v541_v37 = vsel %vm170_vm9, %v535_v32, %v540_v36 }
 0x101   :  { %544 = vst [vmem:[#allocation2 + $0x24] sm:$0xcc] %v541_v37 }
 0x104   :  { %v554_v40 = vpop.permute.xlu1 %553  ;;  %v841_v42 = vld [vmem:[#allocation2 + $0x28] sm:$0xf0]  ;;  %v420_v43 = vpop.permute.xlu0 %419 }
 0x105   :  { %v557_v44 = vrot.slane %v554_v40, 4  ;;  %v810_v45 = vor.u32 %v841_v42, %v809_v41  ;;  %v422_v46 = vrot.slane %v420_v43, 4  ;;  %428 = vst.msk [vmem:[#allocation2 + $0x8] sm:$0xc] %vm51_vm0, %v420_v43  ;;  %v303_v21 = vpop.permute.xlu2 %302 }
 0x107   :  { %v559_v47 = vsel %vm44_vm2, %v557_v44, %v558_v38  ;;  %660 = vmatpush.bf16.msrb.mxu1 %v810_v45  ;;  %v423_v48 = vsel %vm44_vm2, %v421_v39, %v422_v46 }
 0x108   :  { %v560_v49 = vsel %vm190_vm10, %v554_v40, %v559_v47  ;;  %v424_v50 = vsel %vm46_vm3, %v418_v25, %v423_v48  ;;  %v840_v0 = vld [vmem:[#allocation2 + $0x20] sm:$0xf0]  ;;  %v803_v1 = vld [vmem:[#allocation2 + $0x24] sm:$0xf0]  ;;  %vm357_vm3 = vcmask 932864  }
 0x109   :  { %563 = vst [vmem:[#allocation2 + $0x30] sm:$0x33] %v560_v49  ;;  %v802_v9 = vor.u32 %v840_v0, %v801_v6  ;;  %v806_v10 = vor.u32 %v839_v7, %v803_v1 }
 0x10a   :  { %427 = vst [vmem:[#allocation2] sm:$0xcc] %v424_v50 }
 0x10c   :  { %v437_v52 = vpop.permute.xlu1 %436  ;;  %v457_v56 = vpop.permute.xlu0 %456  ;;  %v797_v11 = vld [vmem:[#allocation2 + $0x8] sm:$0xf] }
 0x10d   :  { %v440_v53 = vrot.slane %v437_v52, 4  ;;  %v460_v60 = vrot.slane %v457_v56, 4 }
 0x10f   :  { %v442_v54 = vsel %vm44_vm2, %v440_v53, %v441_v51 }
 0x110   :  { %v443_v55 = vsel %vm67_vm4, %v437_v52, %v442_v54  ;;  %v574_v57 = vld [vmem:[#allocation2 + $0x30] sm:$0x33]  ;;  %vm350_vm4 = vcmask 917248  }
 0x111   :  { %446 = vst [vmem:[#allocation2 + $0xc] sm:$0x33] %v443_v55  ;;  %v598_v58 = vunpack.c.l.b16 %v574_v57  ;;  %v599_v59 = vunpack.c.h.b16 %v574_v57  ;;  %v789_v15 = vld [vmem:[#allocation2] sm:$0xf]  ;;  %v836_v17 = vld [vmem:[#allocation2 + $0x4] sm:$0xf] }
 0x113   :  { %v607_v61 = vpack.c.b16 %v598_v58, %v598_v58  ;;  %v608_v62 = vpack.c.b16 %v599_v59, %v599_v59 }
 0x114   :  { %v459_v63 = vpop.permute.xlu1 %458  ;;  %v1104_v22 = vpop.permute.xlu0 %310 }
 0x115   :  { %v461_v2 = vrot.slane %v459_v63, 4  ;;  %467 = vst.msk [vmem:[#allocation2 + $0x14] sm:$0xc] %vm51_vm0, %v459_v63  ;;  %v620_v3 = vsel %vm251_vm11, %v607_v61, 0  ;;  %v623_v4 = vsel %vm251_vm11, %v608_v62, 0  ;;  %vm335_vm0 = vcmask 523648  }
 0x116   :  { %633 = vmatpush.bf16.msra.mxu3 %v620_v3  ;;  %646 = vmatpush.bf16.msrb.mxu0 %v623_v4 }
 0x117   :  { %v462_v5 = vsel %vm44_vm2, %v460_v60, %v461_v2  ;;  %vm345_vm2 = vcmask 786048  }
 0x118   :  { %v463_v8 = vsel %vm88_vm5, %v457_v56, %v462_v5  ;;  %vm360_vm5 = vcmask 1048448  }
 0x119   :  { %466 = vst [vmem:[#allocation2 + $0xc] sm:$0xcc] %v463_v8 }
 0x11a   :  { %634 = vmatpush.bf16.msra.mxu3 %v802_v9  ;;  %647 = vmatpush.bf16.msrb.mxu0 %v806_v10 }
 0x11c   :  { %v838_v12 = vld [vmem:[#allocation2 + $0x10] sm:$0xf0] }
 0x11d   :  { %v798_v13 = vor.u32 %v838_v12, %v797_v11 }
 0x11f   :  { %661 = vmatpush.bf16.msrb.mxu1 %v798_v13 }
 0x120   :  { %v837_v16 = vld [vmem:[#allocation2 + $0x8] sm:$0xf0]  ;;  %v791_v18 = vld [vmem:[#allocation2 + $0xc] sm:$0xf0] }
 0x121   :  { %v790_v19 = vor.u32 %v837_v16, %v789_v15  ;;  %v794_v20 = vor.u32 %v836_v17, %v791_v18 }
 0x122   :  { %813 = vmatmul.msk.bf16.vlgmr.msrb.gmra.mxu1 %vm247_vm12, %v565_v14 }
 0x123   :  { %635 = vmatpush.bf16.msra.mxu3 %v790_v19  ;;  %648 = vmatpush.bf16.msrb.mxu0 %v794_v20 }
 0x126   :  { %811 = vmatmul.msk.bf16.vlgmr.msra.gmra.mxu3 %vm247_vm12, %v565_v14  ;;  %812 = vmatmul.msk.bf16.vlgmr.msrb.gmra.mxu0 %vm247_vm12, %v565_v14 }
 0x15e   :  { %v270_v23 = vpop.f32.mrf.mxu0  ;;  %v283_v24 = vpop.f32.mrf.mxu1 }
 0x15f   :  { %v305_v25 = vmul.f32 %v303_v21, %v270_v23  ;;  %v306_v27 = vmul.f32 %v303_v21, %v283_v24 }
 0x161   :  { %v313_v26 = vadd.f32 %v1104_v22, %v305_v25  ;;  %v314_v30 = vadd.f32 %v1104_v22, %v306_v27 }
 0x162   :  { %v296_v28 = vpop.f32.mrf.mxu2 }
 0x163   :  { %v316_v29 = vmax.f32 %v313_v26, 0.0  ;;  %v317_v33 = vmax.f32 %v314_v30, 0.0  ;;  %v307_v35 = vmul.f32 %v303_v21, %v296_v28 }
 0x165   :  { %342 = vrot.lane.b32.xlu0 %v316_v29, %s874_s1  ;;  %327 = vrot.lane.b32.xlu2 %v316_v29, %s875_s15  ;;  %320 = vst.msk [vmem:[%s1274_s4] sm:$0xff] %vm319_vm13, %v316_v29  ;;  %v315_v36 = vadd.f32 %v1104_v22, %v307_v35 }
 0x166   :  { %322 = vrot.lane.b32.xlu1 %v316_v29, %s866_s24  ;;  %v272_v31 = vpop.f32.mrf.mxu0  ;;  %v285_v32 = vpop.f32.mrf.mxu1 }
 0x167   :  { %v318_v37 = vmax.f32 %v315_v36, 0.0 }
 0x16a   :  { %v298_v34 = vpop.f32.mrf.mxu2 }
 0x16d   :  { %337 = vrot.lane.b32.xlu2 %v316_v29, %s876_s18  ;;  %355 = vrot.lane.b32.xlu0 %v317_v33, %s877_s19 }
 0x16e   :  { %332 = vrot.lane.b32.xlu1 %v316_v29, %s878_s20 }
 0x175   :  { %353 = vrot.lane.b32.xlu2 %v316_v29, %s877_s19  ;;  %370 = vrot.lane.b32.xlu0 %v317_v33, %s869_s7 }
 0x176   :  { %347 = vrot.lane.b32.xlu1 %v316_v29, %s879_s22 }
 0x17d   :  { %366 = vrot.lane.b32.xlu2 %v317_v33, %s867_s27  ;;  %382 = vrot.lane.b32.xlu0 %v317_v33, %s880_s23 }
 0x17e   :  { %362 = vrot.lane.b32.xlu1 %v317_v33, %s881_s25 }
 0x185   :  { %378 = vrot.lane.b32.xlu2 %v317_v33, %s882_s26  ;;  %395 = vrot.lane.b32.xlu0 %v318_v37, %s883_s28 }
 0x186   :  { %374 = vrot.lane.b32.xlu1 %v317_v33, %s884_s29 }
 0x18d   :  { %389 = vrot.lane.b32.xlu2 %v318_v37, %s885_s5 }
 0x18e   :  { %387 = vrot.lane.b32.xlu1 %v317_v33, %s885_s5 }
 0x19f   :  { %v663_v38 = vpop.f32.mrf.mxu1 }
 0x1a0   :  { %v669_v39 = vmul.f32 %v663_v38, %v303_v21 }
 0x1a2   :  { %v672_v40 = vadd.f32 %v669_v39, %v1104_v22 }
 0x1a3   :  { %v650_v41 = vpop.f32.mrf.mxu0 }
 0x1a4   :  { %v675_v42 = vmax.f32 %v672_v40, 0.0  ;;  %v668_v43 = vmul.f32 %v650_v41, %v303_v21 }
 0x1a6   :  { %v671_v44 = vadd.f32 %v668_v43, %v1104_v22  ;;  %738 = vrot.lane.b32.xlu1 %v675_v42, %s885_s5 }
 0x1a7   :  { %v665_v45 = vpop.f32.mrf.mxu1 }
 0x1a8   :  { %v674_v46 = vmax.f32 %v671_v44, 0.0 }
 0x1a9   :  { %v637_v47 = vpop.f32.mrf.mxu3 }
 0x1aa   :  { %v667_v48 = vmul.f32 %v637_v47, %v303_v21  ;;  %719 = vrot.lane.b32.xlu2 %v674_v46, %s869_s7  ;;  %711 = vrot.lane.b32.xlu0 %v674_v46, %s881_s25 }
 0x1ab   :  { %v652_v49 = vpop.f32.mrf.mxu0 }
 0x1ac   :  { %v670_v50 = vadd.f32 %v667_v48, %v1104_v22 }
 0x1ae   :  { %v673_v51 = vmax.f32 %v670_v50, 0.0  ;;  %715 = vrot.lane.b32.xlu1 %v674_v46, %s867_s27 }
 0x1b0   :  { %814 = vst.msk [vmem:[%s1274_s4 + $0x10] sm:$0xff] %vm319_vm13, %v673_v51 }
 0x1b1   :  { %v639_v52 = vpop.f32.mrf.mxu3 }
 0x1b2   :  { %731 = vrot.lane.b32.xlu2 %v674_v46, %s880_s23  ;;  %727 = vrot.lane.b32.xlu0 %v674_v46, %s882_s26 }
 0x1b6   :  { %723 = vrot.lane.b32.xlu1 %v674_v46, %s884_s29 }
 0x1ba   :  { %683 = vrot.lane.b32.xlu2 %v673_v51, %s875_s15  ;;  %736 = vrot.lane.b32.xlu0 %v674_v46, %s885_s5 }
 0x1be   :  { %679 = vrot.lane.b32.xlu1 %v673_v51, %s866_s24 }
 0x1bf   :  { %v328_v53 = vpop.permute.xlu2 %327 }
 0x1c2   :  { %691 = vrot.lane.b32.xlu2 %v673_v51, %s876_s18  ;;  %687 = vrot.lane.b32.xlu0 %v673_v51, %s878_s20 }
 0x1c6   :  { %695 = vrot.lane.b32.xlu1 %v673_v51, %s874_s1 }
 0x1c7   :  { %v338_v54 = vpop.permute.xlu2 %337 }
 0x1ca   :  { %699 = vrot.lane.b32.xlu2 %v673_v51, %s879_s22  ;;  %704 = vrot.lane.b32.xlu0 %v673_v51, %s877_s19 }
 0x1ce   :  { %706 = vrot.lane.b32.xlu1 %v674_v46, %s877_s19 }
 0x1cf   :  { %v354_v57 = vpop.permute.xlu2 %353 }
 0x1d2   :  { %743 = vrot.lane.b32.xlu2 %v675_v42, %s883_s28 }
 0x1d7   :  { %v343_v56 = vpop.permute.xlu0 %342  ;;  %v367_v60 = vpop.permute.xlu2 %366 }
 0x1d8   :  { %v323_v55 = vpop.permute.xlu1 %322 }
 0x1d9   :  { %326 = vst.msk [vmem:[%s1274_s4] sm:$0xff] %vm325_vm14, %v323_v55 }
 0x1da   :  { %331 = vst.msk [vmem:[%s1274_s4] sm:$0xff] %vm330_vm15, %v328_v53 }
 0x1df   :  { %v356_v59 = vpop.permute.xlu0 %355  ;;  %v379_v1 = vpop.permute.xlu2 %378 }
 0x1e0   :  { %v333_v58 = vpop.permute.xlu1 %332  ;;  %v358_v62 = vsel %vm357_vm3, %v354_v57, %v356_v59 }
 0x1e1   :  { %336 = vst.msk [vmem:[%s1274_s4] sm:$0xff] %vm335_vm0, %v333_v58 }
 0x1e2   :  { %341 = vst.msk [vmem:[%s1274_s4] sm:$0xff] %vm340_vm1, %v338_v54 }
 0x1e3   :  { %346 = vst.msk [vmem:[%s1274_s4] sm:$0xff] %vm345_vm2, %v343_v56 }
 0x1e7   :  { %v371_v63 = vpop.permute.xlu0 %370  ;;  %v390_v4 = vpop.permute.xlu2 %389 }
 0x1e8   :  { %v348_v61 = vpop.permute.xlu1 %347 }
 0x1e9   :  { %351 = vst.msk [vmem:[%s1274_s4] sm:$0xff] %vm350_vm4, %v348_v61 }
 0x1ea   :  { %361 = vst.msk [vmem:[%s1274_s4] sm:$0xff] %vm360_vm5, %v358_v62 }
 0x1ef   :  { %v383_v2 = vpop.permute.xlu0 %382 }
 0x1f0   :  { %v363_v0 = vpop.permute.xlu1 %362 }
 0x1f1   :  { %365 = vst.msk [vmem:[%s1274_s4 + $0x8] sm:$0xff] %vm319_vm13, %v363_v0 }
 0x1f2   :  { %369 = vst.msk [vmem:[%s1274_s4 + $0x8] sm:$0xff] %vm325_vm14, %v367_v60 }
 0x1f3   :  { %373 = vst.msk [vmem:[%s1274_s4 + $0x8] sm:$0xff] %vm330_vm15, %v371_v63 }
 0x1f7   :  { %v396_v7 = vpop.permute.xlu0 %395 }
 0x1f8   :  { %v375_v3 = vpop.permute.xlu1 %374 }
 0x1f9   :  { %377 = vst.msk [vmem:[%s1274_s4 + $0x8] sm:$0xff] %vm335_vm0, %v375_v3 }
 0x1fa   :  { %381 = vst.msk [vmem:[%s1274_s4 + $0x8] sm:$0xff] %vm340_vm1, %v379_v1 }
 0x1fb   :  { %385 = vst.msk [vmem:[%s1274_s4 + $0x8] sm:$0xff] %vm345_vm2, %v383_v2 }
 0x200   :  { %v388_v5 = vpop.permute.xlu1 %387 }
 0x201   :  { %v392_v6 = vsel %vm391_vm6, %v388_v5, %v390_v4 }
 0x202   :  { %394 = vst.msk [vmem:[%s1274_s4 + $0x8] sm:$0xff] %vm350_vm4, %v392_v6 }
 0x203   :  { %398 = vst.msk [vmem:[%s1274_s4 + $0x8] sm:$0xff] %vm360_vm5, %v396_v7 }
 0x204   :  { %v720_v8 = vpop.permute.xlu2 %719 }
 0x20c   :  { %v732_v9 = vpop.permute.xlu2 %731 }
 0x214   :  { %v684_v10 = vpop.permute.xlu2 %683 }
 0x218   :  { %v739_v11 = vpop.permute.xlu1 %738 }
 0x21c   :  { %v692_v12 = vpop.permute.xlu2 %691  ;;  %v712_v13 = vpop.permute.xlu0 %711 }
 0x21d   :  { %822 = vst.msk [vmem:[%s1274_s4 + $0x18] sm:$0xff] %vm319_vm13, %v712_v13 }
 0x220   :  { %v716_v14 = vpop.permute.xlu1 %715 }
 0x221   :  { %823 = vst.msk [vmem:[%s1274_s4 + $0x18] sm:$0xff] %vm325_vm14, %v716_v14 }
 0x222   :  { %824 = vst.msk [vmem:[%s1274_s4 + $0x18] sm:$0xff] %vm330_vm15, %v720_v8 }
 0x224   :  { %v700_v15 = vpop.permute.xlu2 %699  ;;  %v728_v16 = vpop.permute.xlu0 %727 }
 0x228   :  { %v724_v17 = vpop.permute.xlu1 %723 }
 0x229   :  { %825 = vst.msk [vmem:[%s1274_s4 + $0x18] sm:$0xff] %vm335_vm0, %v724_v17 }
 0x22a   :  { %826 = vst.msk [vmem:[%s1274_s4 + $0x18] sm:$0xff] %vm340_vm1, %v728_v16 }
 0x22b   :  { %827 = vst.msk [vmem:[%s1274_s4 + $0x18] sm:$0xff] %vm345_vm2, %v732_v9 }
 0x22c   :  { %v737_v18 = vpop.permute.xlu0 %736  ;;  %v744_v20 = vpop.permute.xlu2 %743 }
 0x22d   :  { %v740_v19 = vsel %vm391_vm6, %v737_v18, %v739_v11 }
 0x22e   :  { %828 = vst.msk [vmem:[%s1274_s4 + $0x18] sm:$0xff] %vm350_vm4, %v740_v19 }
 0x22f   :  { %829 = vst.msk [vmem:[%s1274_s4 + $0x18] sm:$0xff] %vm360_vm5, %v744_v20 }
 0x230   :  { %v680_v21 = vpop.permute.xlu1 %679 }
 0x231   :  { %815 = vst.msk [vmem:[%s1274_s4 + $0x10] sm:$0xff] %vm325_vm14, %v680_v21 }
 0x232   :  { %816 = vst.msk [vmem:[%s1274_s4 + $0x10] sm:$0xff] %vm330_vm15, %v684_v10 }
 0x234   :  { %v688_v22 = vpop.permute.xlu0 %687 }
 0x235   :  { %817 = vst.msk [vmem:[%s1274_s4 + $0x10] sm:$0xff] %vm335_vm0, %v688_v22 }
 0x236   :  { %818 = vst.msk [vmem:[%s1274_s4 + $0x10] sm:$0xff] %vm340_vm1, %v692_v12 }
 0x238   :  { %v696_v23 = vpop.permute.xlu1 %695 }
 0x239   :  { %819 = vst.msk [vmem:[%s1274_s4 + $0x10] sm:$0xff] %vm345_vm2, %v696_v23 }
 0x23a   :  { %820 = vst.msk [vmem:[%s1274_s4 + $0x10] sm:$0xff] %vm350_vm4, %v700_v15 }
 0x23c   :  { %v705_v24 = vpop.permute.xlu0 %704 }
 0x240   :  { %v707_v25 = vpop.permute.xlu1 %706 }
 0x241   :  { %v708_v26 = vsel %vm357_vm3, %v705_v24, %v707_v25 }
 0x242   :  { %821 = vst.msk [vmem:[%s1274_s4 + $0x10] sm:$0xff] %vm360_vm5, %v708_v26 }

// kernel: conv_block_forward.2
= control target key start
LH: loop header
LB: loop body
LE: loop exit
PB: predicated region body
PF: predicated region fallthrough
CT: control target
= control target key end

     0   :  { %s710_s21 = smov 127   ;;  %s711_s24 = smov 126   ;;  %vm26_vm0 = vcmask 238592   ;;  %vm49_vm1 = vcmask 240642   ;;  %vm42_vm2 = vcmask 1043456   ;;  %vm44_vm3 = vcmask 1039360   ;;  %s934_s0 = inlined_call_operand.vmem [shape: bf16[2,4,324], index: 0, kind: input, shape index: {}]   ;;  %s935_s1 = inlined_call_operand.vmem [shape: bf16[8,36], index: 1, kind: input, shape index: {}]   ;;  %s936_s2 = inlined_call_operand.vmem [shape: f32[1,286], index: 2, kind: input, shape index: {}]   ;;  %s937_s3 = inlined_call_operand.vmem [shape: f32[1,8,1], index: 3, kind: output, shape index: {0}]   ;;  %s938_s4 = inlined_call_operand.vmem [shape: f32[1,8,1], index: 4, kind: output, shape index: {1}]  }
   0x1   :  { %v18_v0 = vld [vmem:[%s934_s0] sm:$0x3f]  ;;  %s712_s27 = smov 110   ;;  %s713_s30 = smov 109   ;;  %v654_v25 = vld [vmem:[%s934_s0 + $0x6] sm:$0x3f] }
   0x2   :  { %20 = vst [vmem:[#allocation1] ss:$2 sm:$0xff] %v18_v0  ;;  %v28_v1 = vld [vmem:[%s934_s0] sm:$0x3f]  ;;  %s714_s7 = smov 108   ;;  %s715_s10 = smov 92  }
   0x3   :  { %v51_v4 = vld [vmem:[%s934_s0] sm:$0x3f]  ;;  %s716_s13 = smov 91   ;;  %s717_s16 = smov 90   ;;  %v655_v28 = vld [vmem:[%s934_s0 + $0x6] sm:$0x3f] }
   0x4   :  { %v71_v7 = vld [vmem:[%s934_s0] sm:$0x3f]  ;;  %v656_v31 = vld [vmem:[%s934_s0 + $0x6] sm:$0x3f]  ;;  %vm65_vm4 = vcmask 1031168   ;;  %vm86_vm5 = vcmask 900096  }
   0x5   :  { %v92_v10 = vld [vmem:[%s934_s0] sm:$0x3f]  ;;  %v657_v34 = vld [vmem:[%s934_s0 + $0x6] sm:$0x3f]  ;;  %vm127_vm6 = vcmask 883712   ;;  %vm106_vm7 = vcmask 891904  }
   0x6   :  { %v112_v13 = vld [vmem:[%s934_s0] sm:$0x3f]  ;;  %v658_v37 = vld [vmem:[%s934_s0 + $0x6] sm:$0x3f]  ;;  %vm147_vm8 = vcmask 752640   ;;  %vm168_vm9 = vcmask 744448  }
   0x7   :  { %v133_v16 = vld [vmem:[%s934_s0] sm:$0x3f]  ;;  %v659_v40 = vld [vmem:[%s934_s0 + $0x6] sm:$0x3f]  ;;  %vm188_vm10 = vcmask 736256   ;;  %vm249_vm11 = vcmask 1041408  }
   0x8   :  { %v153_v19 = vld [vmem:[%s934_s0] sm:$0x3f]  ;;  %v660_v43 = vld [vmem:[%s934_s0 + $0x6] sm:$0x3f]  ;;  %vm245_vm12 = vcmask 293888   ;;  %vm309_vm13 = vcmask 244736  }
   0x9   :  { %v21_v2 = vld.sshfl [vmem:[#allocation1] sm:$0xff pattern:$0x75643120]  ;;  %v749_v3 = vld.sshfl [vmem:[#allocation1 + $0x8] sm:$0xff pattern:$0x75643120] }
   0xa   :  { %31 = vst [vmem:[#allocation1 + $0x1] ss:$2 sm:$0xff] %v28_v1  ;;  %v174_v22 = vld [vmem:[%s934_s0] sm:$0x3f]  ;;  %v661_v46 = vld [vmem:[%s934_s0 + $0x6] sm:$0x3f] }
   0xb   :  { %25 = vst [vmem:[#allocation2] sm:$0x33] %v21_v2  ;;  %v662_v54 = vld [vmem:[%s934_s0 + $0x6] sm:$0x3f]  ;;  %vm616_vm14 = vcmask 7168  }
   0xc   :  { %27 = vst.msk [vmem:[#allocation2 + $0x8] sm:$0x3] %vm26_vm0, %v749_v3 }
  0x11   :  { %v32_v5 = vld.sshfl [vmem:[#allocation1] sm:$0xff pattern:$0x75643120]  ;;  %v34_v6 = vld.sshfl [vmem:[#allocation1 + $0x8] sm:$0xff pattern:$0x75643120] }
  0x12   :  { %36 = vrot.lane.b32.xlu0 %v32_v5, %s710_s21  ;;  %53 = vst [vmem:[#allocation1] ss:$2 sm:$0xff] %v51_v4  ;;  %38 = vrot.lane.b32.xlu1 %v34_v6, %s710_s21 }
  0x19   :  { %v56_v8 = vld.sshfl [vmem:[#allocation1 + $0x8] sm:$0xff pattern:$0x75643120]  ;;  %v54_v9 = vld.sshfl [vmem:[#allocation1] sm:$0xff pattern:$0x75643120] }
  0x1a   :  { %60 = vrot.lane.b32.xlu0 %v56_v8, %s711_s24  ;;  %74 = vst [vmem:[#allocation1 + $0x1] ss:$2 sm:$0xff] %v71_v7  ;;  %58 = vrot.lane.b32.xlu2 %v54_v9, %s711_s24 }
  0x21   :  { %v75_v11 = vld.sshfl [vmem:[#allocation1] sm:$0xff pattern:$0x75643120]  ;;  %v77_v12 = vld.sshfl [vmem:[#allocation1 + $0x8] sm:$0xff pattern:$0x75643120] }
  0x22   :  { %94 = vst [vmem:[#allocation1] ss:$2 sm:$0xff] %v92_v10  ;;  %79 = vrot.lane.b32.xlu1 %v75_v11, %s712_s27  ;;  %81 = vrot.lane.b32.xlu2 %v77_v12, %s712_s27 }
  0x29   :  { %v95_v14 = vld.sshfl [vmem:[#allocation1] sm:$0xff pattern:$0x75643120]  ;;  %v97_v15 = vld.sshfl [vmem:[#allocation1 + $0x8] sm:$0xff pattern:$0x75643120] }
  0x2a   :  { %115 = vst [vmem:[#allocation1 + $0x1] ss:$2 sm:$0xff] %v112_v13  ;;  %99 = vrot.lane.b32.xlu1 %v95_v14, %s713_s30 }
  0x31   :  { %v116_v17 = vld.sshfl [vmem:[#allocation1] sm:$0xff pattern:$0x75643120]  ;;  %v118_v18 = vld.sshfl [vmem:[#allocation1 + $0x8] sm:$0xff pattern:$0x75643120] }
  0x32   :  { %135 = vst [vmem:[#allocation1] ss:$2 sm:$0xff] %v133_v16  ;;  %101 = vrot.lane.b32.xlu1 %v97_v15, %s713_s30  ;;  %120 = vrot.lane.b32.xlu2 %v116_v17, %s714_s7 }
  0x39   :  { %v136_v20 = vld.sshfl [vmem:[#allocation1] sm:$0xff pattern:$0x75643120]  ;;  %v138_v21 = vld.sshfl [vmem:[#allocation1 + $0x8] sm:$0xff pattern:$0x75643120] }
  0x3a   :  { %140 = vrot.lane.b32.xlu0 %v136_v20, %s715_s10  ;;  %156 = vst [vmem:[#allocation1 + $0x1] ss:$2 sm:$0xff] %v153_v19  ;;  %142 = vrot.lane.b32.xlu1 %v138_v21, %s715_s10 }
  0x3b   :  { %122 = vrot.lane.b32.xlu2 %v118_v18, %s714_s7 }
  0x41   :  { %v159_v23 = vld.sshfl [vmem:[#allocation1 + $0x8] sm:$0xff pattern:$0x75643120]  ;;  %v157_v24 = vld.sshfl [vmem:[#allocation1] sm:$0xff pattern:$0x75643120] }
  0x42   :  { %163 = vrot.lane.b32.xlu0 %v159_v23, %s716_s13  ;;  %176 = vst [vmem:[#allocation1] ss:$2 sm:$0xff] %v174_v22 }
  0x43   :  { %161 = vrot.lane.b32.xlu2 %v157_v24, %s716_s13 }
  0x49   :  { %v177_v26 = vld.sshfl [vmem:[#allocation1] sm:$0xff pattern:$0x75643120]  ;;  %v179_v27 = vld.sshfl [vmem:[#allocation1 + $0x8] sm:$0xff pattern:$0x75643120] }
  0x4a   :  { %181 = vrot.lane.b32.xlu0 %v177_v26, %s717_s16  ;;  %330 = vst [vmem:[#allocation1] ss:$2 sm:$0xff] %v654_v25 }
  0x51   :  { %v793_v29 = vld.sshfl [vmem:[#allocation1] sm:$0xff pattern:$0x75643120]  ;;  %v795_v30 = vld.sshfl [vmem:[#allocation1 + $0x8] sm:$0xff pattern:$0x75643120] }
  0x52   :  { %183 = vrot.lane.b32.xlu0 %v179_v27, %s717_s16  ;;  %340 = vst [vmem:[#allocation1 + $0x1] ss:$2 sm:$0xff] %v655_v28 }
  0x59   :  { %v801_v32 = vld.sshfl [vmem:[#allocation1] sm:$0xff pattern:$0x75643120]  ;;  %v343_v33 = vld.sshfl [vmem:[#allocation1 + $0x8] sm:$0xff pattern:$0x75643120] }
  0x5a   :  { %359 = vst [vmem:[#allocation1] ss:$2 sm:$0xff] %v656_v31 }
  0x61   :  { %v806_v35 = vld.sshfl [vmem:[#allocation1] sm:$0xff pattern:$0x75643120]  ;;  %v808_v36 = vld.sshfl [vmem:[#allocation1 + $0x8] sm:$0xff pattern:$0x75643120] }
  0x62   :  { %379 = vst [vmem:[#allocation1 + $0x1] ss:$2 sm:$0xff] %v657_v34 }
  0x69   :  { %v813_v38 = vld.sshfl [vmem:[#allocation1] sm:$0xff pattern:$0x75643120]  ;;  %v815_v39 = vld.sshfl [vmem:[#allocation1 + $0x8] sm:$0xff pattern:$0x75643120] }
  0x6a   :  { %398 = vst [vmem:[#allocation1] ss:$2 sm:$0xff] %v658_v37 }
  0x71   :  { %v399_v41 = vld.sshfl [vmem:[#allocation1] sm:$0xff pattern:$0x75643120]  ;;  %v401_v42 = vld.sshfl [vmem:[#allocation1 + $0x8] sm:$0xff pattern:$0x75643120] }
  0x72   :  { %403 = vrot.lane.b32.xlu0 %v399_v41, %s713_s30  ;;  %405 = vrot.lane.b32.xlu1 %v401_v42, %s713_s30  ;;  %418 = vst [vmem:[#allocation1 + $0x1] ss:$2 sm:$0xff] %v659_v40 }
  0x74   :  { %v59_v49 = vpop.permute.xlu2 %58 }
  0x75   :  { %v62_v59 = vrot.slane %v59_v49, 4 }
  0x79   :  { %v421_v44 = vld.sshfl [vmem:[#allocation1 + $0x8] sm:$0xff pattern:$0x75643120]  ;;  %v419_v45 = vld.sshfl [vmem:[#allocation1] sm:$0xff pattern:$0x75643120] }
  0x7a   :  { %425 = vrot.lane.b32.xlu0 %v421_v44, %s714_s7  ;;  %437 = vst [vmem:[#allocation1] ss:$2 sm:$0xff] %v660_v43  ;;  %423 = vrot.lane.b32.xlu2 %v419_v45, %s714_s7 }
  0x7c   :  { %v82_v62 = vpop.permute.xlu2 %81 }
  0x7d   :  { %91 = vst.msk [vmem:[#allocation2 + $0x14] sm:$0xc] %vm49_vm1, %v82_v62  ;;  %v84_v3 = vrot.slane %v82_v62, 4 }
  0x81   :  { %v438_v47 = vld.sshfl [vmem:[#allocation1] sm:$0xff pattern:$0x75643120]  ;;  %v440_v48 = vld.sshfl [vmem:[#allocation1 + $0x8] sm:$0xff pattern:$0x75643120] }
  0x82   :  { %442 = vrot.lane.b32.xlu1 %v438_v47, %s715_s10  ;;  %457 = vst [vmem:[#allocation1 + $0x1] ss:$2 sm:$0xff] %v661_v46  ;;  %444 = vrot.lane.b32.xlu2 %v440_v48, %s715_s10 }
  0x84   :  { %v37_v50 = vpop.permute.xlu0 %36  ;;  %v39_v51 = vpop.permute.xlu1 %38 }
  0x85   :  { %v40_v52 = vrot.slane %v37_v50, 4  ;;  %v41_v53 = vrot.slane %v39_v51, 4  ;;  %50 = vst.msk [vmem:[#allocation2 + $0x8] sm:$0xc] %vm49_vm1, %v39_v51 }
  0x87   :  { %v43_v55 = vsel %vm42_vm2, %v40_v52, %v41_v53 }
  0x88   :  { %v45_v56 = vsel %vm44_vm3, %v37_v50, %v43_v55 }
  0x89   :  { %v460_v57 = vld.sshfl [vmem:[#allocation1 + $0x8] sm:$0xff pattern:$0x75643120]  ;;  %v458_v58 = vld.sshfl [vmem:[#allocation1] sm:$0xff pattern:$0x75643120] }
  0x8a   :  { %464 = vrot.lane.b32.xlu1 %v460_v57, %s716_s13  ;;  %462 = vrot.lane.b32.xlu0 %v458_v58, %s716_s13  ;;  %476 = vst [vmem:[#allocation1] ss:$2 sm:$0xff] %v662_v54 }
  0x8b   :  { %48 = vst [vmem:[#allocation2] sm:$0xcc] %v45_v56 }
  0x8c   :  { %v61_v60 = vpop.permute.xlu0 %60  ;;  %v121_v6 = vpop.permute.xlu2 %120  ;;  %v637_v24 = vld [vmem:[#allocation2 + $0x8] sm:$0xf] }
  0x8d   :  { %v63_v61 = vrot.slane %v61_v60, 4  ;;  %70 = vst.msk [vmem:[#allocation2 + $0x14] sm:$0x3] %vm26_vm0, %v61_v60  ;;  %v124_v10 = vrot.slane %v121_v6, 4 }
  0x8e   :  { %336 = vst.msk [vmem:[#allocation2 + $0x8] sm:$0x3] %vm26_vm0, %v795_v30 }
  0x8f   :  { %v64_v63 = vsel %vm42_vm2, %v62_v59, %v63_v61 }
  0x90   :  { %v66_v0 = vsel %vm65_vm4, %v59_v49, %v64_v63 }
  0x91   :  { %v477_v1 = vld.sshfl [vmem:[#allocation1] sm:$0xff pattern:$0x75643120]  ;;  %v479_v2 = vld.sshfl [vmem:[#allocation1 + $0x8] sm:$0xff pattern:$0x75643120] }
  0x92   :  { %481 = vrot.lane.b32.xlu1 %v477_v1, %s717_s16  ;;  %347 = vrot.lane.b32.xlu0 %v343_v33, %s710_s21  ;;  %69 = vst [vmem:[#allocation2 + $0xc] sm:$0x33] %v66_v0  ;;  %v629_v26 = vld [vmem:[#allocation2] sm:$0xf]  ;;  %v690_v27 = vld [vmem:[#allocation2 + $0x4] sm:$0xf] }
  0x93   :  { %483 = vrot.lane.b32.xlu2 %v479_v2, %s717_s16  ;;  %335 = vst [vmem:[#allocation2] sm:$0x33] %v793_v29 }
  0x94   :  { %v80_v4 = vpop.permute.xlu1 %79  ;;  %v692_v62 = vld [vmem:[#allocation2 + $0x10] sm:$0xf0] }
  0x95   :  { %v83_v5 = vrot.slane %v80_v4, 4  ;;  %v123_v11 = vpop.permute.xlu2 %122  ;;  %v638_v63 = vor.u32 %v692_v62, %v637_v24 }
  0x96   :  { %v125_v12 = vrot.slane %v123_v11, 4  ;;  %132 = vst.msk [vmem:[#allocation2 + $0x20] sm:$0xc] %vm49_vm1, %v123_v11 }
  0x97   :  { %v85_v7 = vsel %vm42_vm2, %v83_v5, %v84_v3 }
  0x98   :  { %v87_v8 = vsel %vm86_vm5, %v80_v4, %v85_v7  ;;  %v126_v13 = vsel %vm42_vm2, %v124_v10, %v125_v12 }
  0x99   :  { %90 = vst [vmem:[#allocation2 + $0xc] sm:$0xcc] %v87_v8  ;;  %v128_v14 = vsel %vm127_vm6, %v121_v6, %v126_v13 }
  0x9a   :  { %364 = vrot.lane.b32.xlu1 %v806_v35, %s711_s24  ;;  %384 = vrot.lane.b32.xlu0 %v813_v38, %s712_s27  ;;  %131 = vst [vmem:[#allocation2 + $0x18] sm:$0xcc] %v128_v14 }
  0x9b   :  { %345 = vrot.lane.b32.xlu2 %v801_v32, %s710_s21 }
  0x9c   :  { %v100_v9 = vpop.permute.xlu1 %99 }
  0x9d   :  { %v103_v15 = vrot.slane %v100_v9, 4  ;;  %v162_v31 = vpop.permute.xlu2 %161 }
  0x9e   :  { %v165_v32 = vrot.slane %v162_v31, 4 }
  0xa0   :  { %v691_v0 = vld [vmem:[#allocation2 + $0x8] sm:$0xf0]  ;;  %v631_v1 = vld [vmem:[#allocation2 + $0xc] sm:$0xf0] }
  0xa1   :  { %v630_v2 = vor.u32 %v691_v0, %v629_v26  ;;  %v634_v3 = vor.u32 %v690_v27, %v631_v1 }
  0xa2   :  { %386 = vrot.lane.b32.xlu1 %v815_v39, %s712_s27 }
  0xa3   :  { %366 = vrot.lane.b32.xlu2 %v808_v36, %s711_s24 }
  0xa4   :  { %v102_v16 = vpop.permute.xlu1 %101 }
  0xa5   :  { %v104_v17 = vrot.slane %v102_v16, 4  ;;  %111 = vst.msk [vmem:[#allocation2 + $0x20] sm:$0x3] %vm26_vm0, %v102_v16 }
  0xa7   :  { %v105_v18 = vsel %vm42_vm2, %v103_v15, %v104_v17 }
  0xa8   :  { %v107_v19 = vsel %vm106_vm7, %v100_v9, %v105_v18 }
  0xa9   :  { %110 = vst [vmem:[#allocation2 + $0x18] sm:$0x33] %v107_v19  ;;  %v194_v19 = vld [vmem:[%s935_s1] sm:$0xf] }
  0xac   :  { %v141_v20 = vpop.permute.xlu0 %140  ;;  %v143_v21 = vpop.permute.xlu1 %142  ;;  %v649_v45 = vld [vmem:[#allocation2 + $0x20] sm:$0xf] }
  0xad   :  { %v144_v22 = vrot.slane %v141_v20, 4  ;;  %v145_v23 = vrot.slane %v143_v21, 4  ;;  %152 = vst.msk [vmem:[#allocation2 + $0x2c] sm:$0x3] %vm26_vm0, %v143_v21 }
  0xaf   :  { %v146_v25 = vsel %vm42_vm2, %v144_v22, %v145_v23 }
  0xb0   :  { %v148_v28 = vsel %vm147_vm8, %v141_v20, %v146_v25  ;;  %v641_v50 = vld [vmem:[#allocation2 + $0x18] sm:$0xf]  ;;  %v693_v55 = vld [vmem:[#allocation2 + $0x1c] sm:$0xf] }
  0xb1   :  { %151 = vst [vmem:[#allocation2 + $0x24] sm:$0x33] %v148_v28 }
  0xb4   :  { %v164_v33 = vpop.permute.xlu0 %163 }
  0xb5   :  { %v166_v34 = vrot.slane %v164_v33, 4  ;;  %173 = vst.msk [vmem:[#allocation2 + $0x2c] sm:$0xc] %vm49_vm1, %v164_v33 }
  0xb7   :  { %v167_v35 = vsel %vm42_vm2, %v165_v32, %v166_v34 }
  0xb8   :  { %v169_v30 = vsel %vm168_vm9, %v162_v31, %v167_v35 }
  0xb9   :  { %172 = vst [vmem:[#allocation2 + $0x24] sm:$0xcc] %v169_v30 }
  0xbc   :  { %v182_v36 = vpop.permute.xlu0 %181  ;;  %v695_v46 = vld [vmem:[#allocation2 + $0x28] sm:$0xf0] }
  0xbd   :  { %v185_v37 = vrot.slane %v182_v36, 4  ;;  %v650_v53 = vor.u32 %v695_v46, %v649_v45 }
  0xc0   :  { %v694_v54 = vld [vmem:[#allocation2 + $0x20] sm:$0xf0]  ;;  %v643_v56 = vld [vmem:[#allocation2 + $0x24] sm:$0xf0] }
  0xc1   :  { %v642_v60 = vor.u32 %v694_v54, %v641_v50  ;;  %v646_v61 = vor.u32 %v693_v55, %v643_v56 }
  0xc4   :  { %v184_v38 = vpop.permute.xlu0 %183 }
  0xc5   :  { %v186_v39 = vrot.slane %v184_v38, 4  ;;  %193 = vst.msk [vmem:[#allocation2 + $0x38] sm:$0x3] %vm26_vm0, %v184_v38 }
  0xc7   :  { %v187_v29 = vsel %vm42_vm2, %v185_v37, %v186_v39 }
  0xc8   :  { %v189_v40 = vsel %vm188_vm10, %v182_v36, %v187_v29 }
  0xc9   :  { %192 = vst [vmem:[#allocation2 + $0x30] sm:$0x33] %v189_v40 }
  0xcc   :  { %v204_v41 = vld [vmem:[#allocation2 + $0x38] sm:$0x3] }
  0xcd   :  { %v229_v42 = vunpack.c.l.b16 %v204_v41 }
  0xcf   :  { %v238_v43 = vpack.c.b16 %v229_v42, %v229_v42 }
  0xd0   :  { %v203_v44 = vld [vmem:[#allocation2 + $0x30] sm:$0x33] }
  0xd1   :  { %v257_v47 = vsel %vm249_vm11, %v238_v43, 0  ;;  %v227_v48 = vunpack.c.l.b16 %v203_v44  ;;  %v228_v49 = vunpack.c.h.b16 %v203_v44 }
  0xd2   :  { %290 = vmatpush.bf16.msra.mxu2 %v257_v47 }
  0xd3   :  { %v236_v51 = vpack.c.b16 %v227_v48, %v227_v48  ;;  %v237_v52 = vpack.c.b16 %v228_v49, %v228_v49 }
  0xd4   :  { %v424_v57 = vpop.permute.xlu2 %423 }
  0xd5   :  { %v251_v58 = vsel %vm249_vm11, %v236_v51, 0  ;;  %v254_v59 = vsel %vm249_vm11, %v237_v52, 0  ;;  %v427_v11 = vrot.slane %v424_v57, 4 }
  0xd6   :  { %264 = vmatpush.bf16.msra.mxu0 %v251_v58  ;;  %277 = vmatpush.bf16.msra.mxu1 %v254_v59 }
  0xd7   :  { %291 = vmatpush.bf16.msra.mxu2 %v650_v53 }
  0xda   :  { %265 = vmatpush.bf16.msra.mxu0 %v642_v60  ;;  %278 = vmatpush.bf16.msra.mxu1 %v646_v61 }
  0xdb   :  { %292 = vmatpush.bf16.msra.mxu2 %v638_v63 }
  0xdc   :  { %v445_v4 = vpop.permute.xlu2 %444 }
  0xdd   :  { %453 = vst.msk [vmem:[#allocation2 + $0x2c] sm:$0x3] %vm26_vm0, %v445_v4  ;;  %v447_v17 = vrot.slane %v445_v4, 4 }
  0xde   :  { %266 = vmatpush.bf16.msra.mxu0 %v630_v2  ;;  %279 = vmatpush.bf16.msra.mxu1 %v634_v3 }
  0xdf   :  { %653 = vmatmul.msk.bf16.vlgmr.msra.gmra.mxu2 %vm245_vm12, %v194_v19 }
  0xe1   :  { %651 = vmatmul.msk.bf16.vlgmr.msra.gmra.mxu0 %vm245_vm12, %v194_v19  ;;  %652 = vmatmul.msk.bf16.vlgmr.msra.gmra.mxu1 %vm245_vm12, %v194_v19 }
  0xe4   :  { %v404_v5 = vpop.permute.xlu0 %403  ;;  %v406_v6 = vpop.permute.xlu1 %405 }
  0xe5   :  { %v407_v7 = vrot.slane %v404_v5, 4  ;;  %v408_v8 = vrot.slane %v406_v6, 4  ;;  %414 = vst.msk [vmem:[#allocation2 + $0x20] sm:$0x3] %vm26_vm0, %v406_v6 }
  0xe7   :  { %v409_v9 = vsel %vm42_vm2, %v407_v7, %v408_v8 }
  0xe8   :  { %v410_v10 = vsel %vm106_vm7, %v404_v5, %v409_v9 }
  0xe9   :  { %413 = vst [vmem:[#allocation2 + $0x18] sm:$0x33] %v410_v10 }
  0xec   :  { %v426_v12 = vpop.permute.xlu0 %425 }
  0xed   :  { %v428_v13 = vrot.slane %v426_v12, 4  ;;  %434 = vst.msk [vmem:[#allocation2 + $0x20] sm:$0xc] %vm49_vm1, %v426_v12  ;;  %v484_v14 = vpop.permute.xlu2 %483  ;;  %v493_v12 = vld [vmem:[%s935_s1] sm:$0xf] }
  0xee   :  { %492 = vst.msk [vmem:[#allocation2 + $0x38] sm:$0x3] %vm26_vm0, %v484_v14  ;;  %v486_v36 = vrot.slane %v484_v14, 4 }
  0xef   :  { %v429_v15 = vsel %vm42_vm2, %v427_v11, %v428_v13 }
  0xf0   :  { %v430_v16 = vsel %vm127_vm6, %v424_v57, %v429_v15 }
  0xf1   :  { %433 = vst [vmem:[#allocation2 + $0x18] sm:$0xcc] %v430_v16 }
  0xf4   :  { %v443_v18 = vpop.permute.xlu1 %442  ;;  %v685_v39 = vld [vmem:[#allocation2 + $0x20] sm:$0xf] }
  0xf5   :  { %v446_v20 = vrot.slane %v443_v18, 4  ;;  %v503_v21 = vld [vmem:[#allocation2 + $0x38] sm:$0x3]  ;;  %v346_v22 = vpop.permute.xlu2 %345 }
  0xf6   :  { %v528_v23 = vunpack.c.l.b16 %v503_v21  ;;  %v349_v37 = vrot.slane %v346_v22, 4 }
  0xf7   :  { %v448_v24 = vsel %vm42_vm2, %v446_v20, %v447_v17 }
  0xf8   :  { %v449_v25 = vsel %vm147_vm8, %v443_v18, %v448_v24  ;;  %v537_v26 = vpack.c.b16 %v528_v23, %v528_v23  ;;  %v677_v3 = vld [vmem:[#allocation2 + $0x18] sm:$0xf]  ;;  %v699_v4 = vld [vmem:[#allocation2 + $0x1c] sm:$0xf] }
  0xf9   :  { %452 = vst [vmem:[#allocation2 + $0x24] sm:$0x33] %v449_v25  ;;  %v17_v18 = vld [vmem:[%s936_s2] sm:$0x7] }
  0xfa   :  { %v554_v27 = vsel %vm249_vm11, %v537_v26, 0  ;;  %v299_v19 = vperm.slane %v17_v18, 0  ;;  %v300_v20 = vperm.slane %v17_v18, 1 }
  0xfb   :  { %587 = vmatpush.bf16.msrb.mxu1 %v554_v27  ;;  %v301_v27 = vperm.slane %v17_v18, 2 }
  0xfc   :  { %v465_v28 = vpop.permute.xlu1 %464  ;;  %v463_v31 = vpop.permute.xlu0 %462 }
  0xfd   :  { %v467_v32 = vrot.slane %v465_v28, 4  ;;  %473 = vst.msk [vmem:[#allocation2 + $0x2c] sm:$0xc] %vm49_vm1, %v465_v28  ;;  %v466_v33 = vrot.slane %v463_v31, 4  ;;  %v367_v34 = vpop.permute.xlu2 %366 }
  0xfe   :  { %375 = vst.msk [vmem:[#allocation2 + $0x14] sm:$0x3] %vm26_vm0, %v367_v34  ;;  %v369_v48 = vrot.slane %v367_v34, 4 }
  0xff   :  { %v468_v35 = vsel %vm42_vm2, %v466_v33, %v467_v32 }
 0x100   :  { %v469_v30 = vsel %vm168_vm9, %v463_v31, %v468_v35 }
 0x101   :  { %472 = vst [vmem:[#allocation2 + $0x24] sm:$0xcc] %v469_v30 }
 0x104   :  { %v482_v38 = vpop.permute.xlu1 %481  ;;  %v701_v29 = vld [vmem:[#allocation2 + $0x28] sm:$0xf0]  ;;  %v348_v40 = vpop.permute.xlu0 %347 }
 0x105   :  { %v485_v41 = vrot.slane %v482_v38, 4  ;;  %v686_v42 = vor.u32 %v701_v29, %v685_v39  ;;  %v350_v43 = vrot.slane %v348_v40, 4  ;;  %356 = vst.msk [vmem:[#allocation2 + $0x8] sm:$0xc] %vm49_vm1, %v348_v40 }
 0x107   :  { %v487_v44 = vsel %vm42_vm2, %v485_v41, %v486_v36  ;;  %588 = vmatpush.bf16.msrb.mxu1 %v686_v42  ;;  %v351_v45 = vsel %vm42_vm2, %v349_v37, %v350_v43 }
 0x108   :  { %v488_v46 = vsel %vm188_vm10, %v482_v38, %v487_v44  ;;  %v352_v47 = vsel %vm44_vm3, %v346_v22, %v351_v45  ;;  %v700_v61 = vld [vmem:[#allocation2 + $0x20] sm:$0xf0]  ;;  %v679_v62 = vld [vmem:[#allocation2 + $0x24] sm:$0xf0] }
 0x109   :  { %491 = vst [vmem:[#allocation2 + $0x30] sm:$0x33] %v488_v46  ;;  %v678_v6 = vor.u32 %v700_v61, %v677_v3  ;;  %v682_v7 = vor.u32 %v699_v4, %v679_v62 }
 0x10a   :  { %355 = vst [vmem:[#allocation2] sm:$0xcc] %v352_v47 }
 0x10c   :  { %v365_v49 = vpop.permute.xlu1 %364  ;;  %v385_v53 = vpop.permute.xlu0 %384  ;;  %v673_v8 = vld [vmem:[#allocation2 + $0x8] sm:$0xf] }
 0x10d   :  { %v368_v50 = vrot.slane %v365_v49, 4  ;;  %v388_v57 = vrot.slane %v385_v53, 4 }
 0x10f   :  { %v370_v51 = vsel %vm42_vm2, %v368_v50, %v369_v48 }
 0x110   :  { %v371_v52 = vsel %vm65_vm4, %v365_v49, %v370_v51  ;;  %v502_v54 = vld [vmem:[#allocation2 + $0x30] sm:$0x33] }
 0x111   :  { %374 = vst [vmem:[#allocation2 + $0xc] sm:$0x33] %v371_v52  ;;  %v526_v55 = vunpack.c.l.b16 %v502_v54  ;;  %v527_v56 = vunpack.c.h.b16 %v502_v54  ;;  %v665_v11 = vld [vmem:[#allocation2] sm:$0xf]  ;;  %v696_v14 = vld [vmem:[#allocation2 + $0x4] sm:$0xf] }
 0x113   :  { %v535_v58 = vpack.c.b16 %v526_v55, %v526_v55  ;;  %v536_v59 = vpack.c.b16 %v527_v56, %v527_v56 }
 0x114   :  { %v387_v60 = vpop.permute.xlu1 %386 }
 0x115   :  { %v389_v63 = vrot.slane %v387_v60, 4  ;;  %395 = vst.msk [vmem:[#allocation2 + $0x14] sm:$0xc] %vm49_vm1, %v387_v60  ;;  %v548_v0 = vsel %vm249_vm11, %v535_v58, 0  ;;  %v551_v1 = vsel %vm249_vm11, %v536_v59, 0 }
 0x116   :  { %561 = vmatpush.bf16.msra.mxu3 %v548_v0  ;;  %574 = vmatpush.bf16.msrb.mxu0 %v551_v1 }
 0x117   :  { %v390_v2 = vsel %vm42_vm2, %v388_v57, %v389_v63 }
 0x118   :  { %v391_v5 = vsel %vm86_vm5, %v385_v53, %v390_v2 }
 0x119   :  { %394 = vst [vmem:[#allocation2 + $0xc] sm:$0xcc] %v391_v5 }
 0x11a   :  { %562 = vmatpush.bf16.msra.mxu3 %v678_v6  ;;  %575 = vmatpush.bf16.msrb.mxu0 %v682_v7 }
 0x11c   :  { %v698_v9 = vld [vmem:[#allocation2 + $0x10] sm:$0xf0] }
 0x11d   :  { %v674_v10 = vor.u32 %v698_v9, %v673_v8 }
 0x11f   :  { %589 = vmatpush.bf16.msrb.mxu1 %v674_v10 }
 0x120   :  { %v697_v13 = vld [vmem:[#allocation2 + $0x8] sm:$0xf0]  ;;  %v667_v15 = vld [vmem:[#allocation2 + $0xc] sm:$0xf0] }
 0x121   :  { %v666_v16 = vor.u32 %v697_v13, %v665_v11  ;;  %v670_v17 = vor.u32 %v696_v14, %v667_v15 }
 0x122   :  { %689 = vmatmul.msk.bf16.vlgmr.msrb.gmra.mxu1 %vm245_vm12, %v493_v12 }
 0x123   :  { %563 = vmatpush.bf16.msra.mxu3 %v666_v16  ;;  %576 = vmatpush.bf16.msrb.mxu0 %v670_v17 }
 0x126   :  { %687 = vmatmul.msk.bf16.vlgmr.msra.gmra.mxu3 %vm245_vm12, %v493_v12  ;;  %688 = vmatmul.msk.bf16.vlgmr.msrb.gmra.mxu0 %vm245_vm12, %v493_v12 }
 0x15e   :  { %v268_v21 = vpop.f32.mrf.mxu0  ;;  %v281_v22 = vpop.f32.mrf.mxu1 }
 0x15f   :  { %v315_v23 = vmul.f32 %v268_v21, %v268_v21  ;;  %v316_v24 = vmul.f32 %v281_v22, %v281_v22  ;;  %v305_v25 = vmul.f32 %v299_v19, %v268_v21  ;;  %v306_v26 = vmul.f32 %v300_v20, %v281_v22 }
 0x161   :  { %v318_v28 = vmul.f32 %v315_v23, %v299_v19  ;;  %v319_v31 = vmul.f32 %v316_v24, %v300_v20  ;;  %v308_v33 = vadd.f32 %v306_v26, %v305_v25 }
 0x162   :  { %v294_v32 = vpop.f32.mrf.mxu2 }
 0x163   :  { %v307_v30 = vmul.f32 %v301_v27, %v294_v32  ;;  %v317_v36 = vmul.f32 %v294_v32, %v294_v32  ;;  %v321_v37 = vadd.f32 %v319_v31, %v318_v28 }
 0x165   :  { %v320_v38 = vmul.f32 %v317_v36, %v301_v27  ;;  %v310_v39 = vsel %vm309_vm13, %v307_v30, 0.0 }
 0x166   :  { %v270_v34 = vpop.f32.mrf.mxu0  ;;  %v283_v35 = vpop.f32.mrf.mxu1  ;;  %v311_v29 = vadd.f32 %v310_v39, %v308_v33 }
 0x167   :  { %v322_v40 = vsel %vm309_vm13, %v320_v38, 0.0 }
 0x168   :  { %312 = vadd.xlane.f32.xlu2 %v311_v29  ;;  %v323_v41 = vadd.f32 %v322_v40, %v321_v37 }
 0x16a   :  { %324 = vadd.xlane.f32.xlu0 %v323_v41  ;;  %v296_v42 = vpop.f32.mrf.mxu2 }
 0x19f   :  { %v591_v43 = vpop.f32.mrf.mxu1 }
 0x1a0   :  { %v606_v45 = vmul.f32 %v591_v43, %v591_v43  ;;  %v597_v47 = vmul.f32 %v591_v43, %v301_v27 }
 0x1a2   :  { %v609_v50 = vmul.f32 %v606_v45, %v301_v27  ;;  %v599_v56 = vsel %vm309_vm13, %v597_v47, 0.0 }
 0x1a3   :  { %v578_v44 = vpop.f32.mrf.mxu0 }
 0x1a4   :  { %v605_v46 = vmul.f32 %v578_v44, %v578_v44  ;;  %v596_v49 = vmul.f32 %v578_v44, %v300_v20  ;;  %v611_v59 = vsel %vm309_vm13, %v609_v50, 0.0 }
 0x1a6   :  { %v608_v52 = vmul.f32 %v605_v46, %v300_v20 }
 0x1a7   :  { %v593_v48 = vpop.f32.mrf.mxu1 }
 0x1a9   :  { %v565_v51 = vpop.f32.mrf.mxu3 }
 0x1aa   :  { %v595_v53 = vmul.f32 %v565_v51, %v299_v19  ;;  %v604_v54 = vmul.f32 %v565_v51, %v565_v51 }
 0x1ab   :  { %v580_v55 = vpop.f32.mrf.mxu0 }
 0x1ac   :  { %v607_v57 = vmul.f32 %v604_v54, %v299_v19  ;;  %v598_v58 = vadd.f32 %v596_v49, %v595_v53 }
 0x1ae   :  { %v600_v60 = vadd.f32 %v599_v56, %v598_v58  ;;  %v610_v61 = vadd.f32 %v608_v52, %v607_v57 }
 0x1b0   :  { %601 = vadd.xlane.f32.xlu1 %v600_v60  ;;  %v612_v62 = vadd.f32 %v611_v59, %v610_v61 }
 0x1b1   :  { %v567_v63 = vpop.f32.mrf.mxu3 }
 0x1b2   :  { %613 = vadd.xlane.f32.xlu2 %v612_v62 }
 0x1db   :  { %v313_v0 = vpop.xlane.xlu2 %312 }
 0x1dd   :  { %v325_v3 = vpop.xlane.xlu0 %324 }
 0x223   :  { %v602_v1 = vpop.xlane.xlu1 %601 }
 0x224   :  { %v603_v2 = vadd.f32 %v602_v1, %v313_v0 }
 0x225   :  { %v614_v4 = vpop.xlane.xlu2 %613 }
 0x226   :  { %617 = vst.msk [vmem:[%s937_s3] sm:$0xff] %vm616_vm14, %v603_v2  ;;  %v615_v5 = vadd.f32 %v614_v4, %v325_v3 }
 0x228   :  { %618 = vst.msk [vmem:[%s938_s4] sm:$0xff] %vm616_vm14, %v615_v5 }

</bundles_post_ra>
